<compile_context>
chip_gen: v7x
topology: tpu7x:2x2x1
jax: 0.10.0
libtpu: 0.0.40
codegen_flags: <defaults>
</compile_context>

<pallas_src>
import functools

import jax
import jax.numpy as jnp
from jax.experimental import pallas as pl
from jax.experimental.pallas import tpu as pltpu


# 3x3 taps excluding the center, in a fixed order shared by the kernel and the mask builder.
_TAPS = ((-1, -1), (-1, 0), (-1, 1), (0, -1), (0, 1), (1, -1), (1, 0), (1, 1))
# SMEM scalar layout: [b_sq1, b_sq2, w_comb0, w_comb1, b_comb_conv,
#                      w_adj1[0..8], b_adj1, w_adj2[0..8], b_adj2]
_OFF_SQ = 0
_OFF_ADJ1 = 5
_OFF_ADJ2 = 15


def _sigmoid(z):
    # exp -> EUP slot.  Exact divide kept for tight numerical agreement with the reference;
    # pl.reciprocal(1+exp(-z), approx=True) is a valid EUP-only variant if looser accuracy is OK.
    return 1.0 / (1.0 + jnp.exp(-z))


def _duse_kernel(H, W, C, B,
                 x1_ref, x2_ref, wmat_ref, colv_ref, masks_ref, scal_ref,
                 out1_ref, out2_ref,
                 comb_buf, adj1_buf, adj2_buf):
    """One grid step = B batch elements.  Activation blocks are (B, C, H*W), channels-first."""
    HW = H * W
    inv_hw = 1.0 / float(HW)

    # -------- packed weights (loaded once per step; DMA skipped across revisits) --------
    wmat = wmat_ref[...]                       # (4C+1, C) f32
    waT = wmat[0:C]                            # fc_comb weight, 1st-half, (in, out)
    wbT = wmat[C:2 * C]                        # fc_comb weight, 2nd-half, (in, out)
    w1 = wmat[2 * C:3 * C]                     # fc_ch1 weight, torch (out, in)
    w2 = wmat[3 * C:4 * C]                     # fc_ch2 weight, torch (out, in)
    b_comb = wmat[4 * C:4 * C + 1]             # (1, C)

    colv = colv_ref[...]                       # (C, 8) f32
    b_ch1 = colv[:, 0:1]
    b_ch2 = colv[:, 1:2]
    wsq1 = colv[:, 2:3]
    wsq2 = colv[:, 3:4]
    bns1 = colv[:, 4:5]
    bnb1 = colv[:, 5:6]
    bns2 = colv[:, 6:7]
    bnb2 = colv[:, 7:8]

    # -------- phase 1: per element, channel-SE gates + spatial squeeze row --------
    g1_cols = []
    g2_cols = []
    for b in range(B):                          # static unroll over the batch tile
        x1 = x1_ref[b].astype(jnp.float32)      # (C, HW)
        x2 = x2_ref[b].astype(jnp.float32)

        # global average pool (lane reduction)
        s1 = jnp.sum(x1, axis=1, keepdims=True) * inv_hw      # (C, 1)
        s2 = jnp.sum(x2, axis=1, keepdims=True) * inv_hw

        # fc_comb(concat(s1, s2)) = Wa @ s1 + Wb @ s2 + b : VPU FMAs + sublane reduce
        fc_row = (jnp.sum(waT * s1, axis=0, keepdims=True)
                  + jnp.sum(wbT * s2, axis=0, keepdims=True)
                  + b_comb)                                    # (1, C)

        # fc_ch{1,2}: lane reduction -> per-channel gate columns
        g1_cols.append(_sigmoid(jnp.sum(w1 * fc_row, axis=1, keepdims=True) + b_ch1))  # (C,1)
        g2_cols.append(_sigmoid(jnp.sum(w2 * fc_row, axis=1, keepdims=True) + b_ch2))  # (C,1)

        # 1x1 squeeze convs (C -> 1) + 1x1 comb conv (2 -> 1); store row b of the comb map
        sq1 = jnp.sum(x1 * wsq1, axis=0, keepdims=True) + scal_ref[_OFF_SQ + 0]   # (1, HW)
        sq2 = jnp.sum(x2 * wsq2, axis=0, keepdims=True) + scal_ref[_OFF_SQ + 1]
        comb_buf[pl.ds(b, 1), :] = (scal_ref[_OFF_SQ + 2] * sq1
                                    + scal_ref[_OFF_SQ + 3] * sq2
                                    + scal_ref[_OFF_SQ + 4])

    # -------- phase 2: two 3x3 convs (padding=1) on the stacked (B, HW) comb map --------
    # 8 masked lane rotations, each shared between both convs (only the scalar weights differ).
    comb = comb_buf[...]                         # (B, HW)
    masks = masks_ref[...]                       # (8, HW), {0,1} f32, hoisted from the wrapper
    acc1 = scal_ref[_OFF_ADJ1 + 4] * comb + scal_ref[_OFF_ADJ1 + 9]   # center tap + bias
    acc2 = scal_ref[_OFF_ADJ2 + 4] * comb + scal_ref[_OFF_ADJ2 + 9]
    for t, (dr, dc) in enumerate(_TAPS):
        shift = (-(dr * W + dc)) % HW            # nbr[p] = comb[p + dr*W + dc]
        nbr = pltpu.roll(comb, shift, axis=1) * masks[t:t + 1, :]
        k = 3 * (dr + 1) + (dc + 1)
        acc1 = acc1 + scal_ref[_OFF_ADJ1 + k] * nbr
        acc2 = acc2 + scal_ref[_OFF_ADJ2 + k] * nbr
    adj1_buf[...] = _sigmoid(acc1)               # (B, HW) spatial gates
    adj2_buf[...] = _sigmoid(acc2)

    # -------- phase 3: fuse + folded BatchNorm, per element --------
    for b in range(B):
        x1 = x1_ref[b].astype(jnp.float32)       # (C, HW)
        x2 = x2_ref[b].astype(jnp.float32)
        adj1 = adj1_buf[pl.ds(b, 1), :]          # (1, HW)
        adj2 = adj2_buf[pl.ds(b, 1), :]
        # x + x*g + x*adj == x * (1 + g + adj); BN folded to per-channel scale/shift.
        out1_ref[b] = ((x1 * (1.0 + g1_cols[b] + adj1)) * bns1 + bnb1).astype(out1_ref.dtype)
        out2_ref[b] = ((x2 * (1.0 + g2_cols[b] + adj2)) * bns2 + bnb2).astype(out2_ref.dtype)


def _pick_b_tile(n, c, hw, itemsize):
    """Batch-tile size: amortize per-step overhead, keep VMEM modest (v7x has 64 MiB),
    keep >=2 grid steps when possible so 'parallel' can shard across v7x's 2 TensorCores."""
    per_elem = 2 * 2 * 2 * c * hw * itemsize          # 2 streams x (in+out) x double-buffered
    cap = max(1, (16 * 1024 * 1024) // max(per_elem, 1))
    cap = min(cap, 8)                                 # bound the unrolled per-element loop
    if n >= 2:
        cap = min(cap, -(-n // 2))
    b_tile = 1
    for d in range(1, min(cap, n) + 1):
        if n % d == 0:                                # keep uniform (exactly dividing) blocks
            b_tile = d
    return b_tile


def duse_attention(x1_nchw, x2_nchw, params):
    n, c, h, w = x1_nchw.shape
    hw = h * w
    dtype = x1_nchw.dtype
    f32 = jnp.float32

    # NCHW -> (N, C, H*W): contiguous (free) reshape, native dtype at the HBM boundary.
    x1 = x1_nchw.reshape(n, c, hw)
    x2 = x2_nchw.reshape(n, c, hw)

    # Fold inference-mode BatchNorm into per-channel scale/shift.
    eps = 1e-5
    scale1 = params["bn1_gamma"] * jax.lax.rsqrt(params["bn1_var"] + eps)
    shift1 = params["bn1_beta"] - params["bn1_mean"] * scale1
    scale2 = params["bn2_gamma"] * jax.lax.rsqrt(params["bn2_var"] + eps)
    shift2 = params["bn2_beta"] - params["bn2_mean"] * scale2

    # One packed (4C+1, C) block: fc_comb halves (transposed to (in,out)), fc_ch1/2 (out,in),
    # and the fc_comb bias row.
    w_comb = params["w_fc_comb"].astype(f32)                    # (C, 2C) torch Linear layout
    wmat = jnp.concatenate([
        w_comb[:, :c].T, w_comb[:, c:].T,
        params["w_fc_ch1"].astype(f32),
        params["w_fc_ch2"].astype(f32),
        params["b_fc_comb"].reshape(1, c).astype(f32),
    ], axis=0)                                                  # (4C+1, C)

    # One packed (C, 8) block of per-channel column vectors.
    colv = jnp.stack([
        params["b_fc_ch1"], params["b_fc_ch2"],
        params["w_sq1"].reshape(c), params["w_sq2"].reshape(c),
        scale1, shift1, scale2, shift2,
    ], axis=1).astype(f32)                                      # (C, 8)

    # All tiny conv scalars in one SMEM array.
    scal = jnp.concatenate([
        params["b_sq1"].reshape(1), params["b_sq2"].reshape(1),
        params["w_conv_comb"].reshape(2), params["b_conv_comb"].reshape(1),
        params["w_adj1"].reshape(9), params["b_adj1"].reshape(1),
        params["w_adj2"].reshape(9), params["b_adj2"].reshape(1),
    ]).astype(f32)                                              # (25,)

    # 3x3-conv zero-padding masks for the 8 non-center taps (hoisted out of the kernel body).
    pos = jnp.arange(hw, dtype=jnp.int32)
    row = pos // w
    col = pos % w

    def _tap_mask(dr, dc):
        m = jnp.ones((hw,), f32)
        if dr == -1:
            m = m * (row >= 1)
        if dr == 1:
            m = m * (row <= h - 2)
        if dc == -1:
            m = m * (col >= 1)
        if dc == 1:
            m = m * (col <= w - 2)
        return m

    masks = jnp.stack([_tap_mask(dr, dc) for dr, dc in _TAPS], axis=0)   # (8, HW)

    b_tile = _pick_b_tile(n, c, hw, x1_nchw.dtype.itemsize)
    grid = (n // b_tile,)

    act_spec = lambda: pl.BlockSpec((b_tile, c, hw), lambda i: (i, 0, 0))
    const_spec = lambda shape: pl.BlockSpec(shape, lambda i, _nd=len(shape): (0,) * _nd)

    out1, out2 = pl.pallas_call(
        functools.partial(_duse_kernel, h, w, c, b_tile),
        out_shape=(jax.ShapeDtypeStruct((n, c, hw), dtype),
                   jax.ShapeDtypeStruct((n, c, hw), dtype)),
        grid=grid,
        in_specs=[
            act_spec(), act_spec(),
            const_spec((4 * c + 1, c)),
            const_spec((c, 8)),
            const_spec((8, hw)),
            pl.BlockSpec(memory_space=pltpu.MemorySpace.SMEM),
        ],
        out_specs=(act_spec(), act_spec()),
        scratch_shapes=[
            pltpu.VMEM((b_tile, hw), f32),   # comb map (stacked across the batch tile)
            pltpu.VMEM((b_tile, hw), f32),   # spatial gate, stream 1
            pltpu.VMEM((b_tile, hw), f32),   # spatial gate, stream 2
        ],
        compiler_params=pltpu.CompilerParams(dimension_semantics=("parallel",)),
    )(x1, x2, wmat, colv, masks, scal)

    return out1.reshape(n, c, h, w), out2.reshape(n, c, h, w)


# ----------------------- pure-JAX reference (eval-mode BN) -----------------------
def duse_reference(x1, x2, p):
    n, c, h, w = x1.shape
    f32 = jnp.float32
    eps = 1e-5
    x1f = x1.astype(f32)
    x2f = x2.astype(f32)

    s1 = jnp.mean(x1f, axis=(2, 3))
    s2 = jnp.mean(x2f, axis=(2, 3))
    fc = jnp.concatenate([s1, s2], axis=1) @ p["w_fc_comb"].T + p["b_fc_comb"]
    g1 = jax.nn.sigmoid(fc @ p["w_fc_ch1"].T + p["b_fc_ch1"])
    g2 = jax.nn.sigmoid(fc @ p["w_fc_ch2"].T + p["b_fc_ch2"])

    sq1 = jnp.einsum("nchw,c->nhw", x1f, p["w_sq1"].reshape(c)) + p["b_sq1"][0]
    sq2 = jnp.einsum("nchw,c->nhw", x2f, p["w_sq2"].reshape(c)) + p["b_sq2"][0]
    wcc = p["w_conv_comb"].reshape(2)
    comb = wcc[0] * sq1 + wcc[1] * sq2 + p["b_conv_comb"][0]

    def conv3x3(m, k33, bias):
        mp = jnp.pad(m, ((0, 0), (1, 1), (1, 1)))
        out = jnp.full_like(m, bias)
        for a in range(3):
            for b in range(3):
                out = out + k33[a, b] * mp[:, a:a + h, b:b + w]
        return out

    adj1 = jax.nn.sigmoid(conv3x3(comb, p["w_adj1"].reshape(3, 3), p["b_adj1"][0]))
    adj2 = jax.nn.sigmoid(conv3x3(comb, p["w_adj2"].reshape(3, 3), p["b_adj2"][0]))

    def bn(y, g, b_, mean, var):
        sc = g * jax.lax.rsqrt(var + eps)
        sh = b_ - mean * sc
        return y * sc[None, :, None, None] + sh[None, :, None, None]

    y1 = x1f * (1.0 + g1[:, :, None, None] + adj1[:, None, :, :])
    y2 = x2f * (1.0 + g2[:, :, None, None] + adj2[:, None, :, :])
    return (bn(y1, p["bn1_gamma"], p["bn1_beta"], p["bn1_mean"], p["bn1_var"]),
            bn(y2, p["bn2_gamma"], p["bn2_beta"], p["bn2_mean"], p["bn2_var"]))


def init_params(key, c):
    ks = jax.random.split(key, 24)
    rnd = lambda k, shp, s=0.3: jax.random.normal(k, shp, jnp.float32) * s
    return {
        "w_fc_comb": rnd(ks[0], (c, 2 * c)), "b_fc_comb": rnd(ks[1], (c,)),
        "w_fc_ch1": rnd(ks[2], (c, c)),      "b_fc_ch1": rnd(ks[3], (c,)),
        "w_fc_ch2": rnd(ks[4], (c, c)),      "b_fc_ch2": rnd(ks[5], (c,)),
        "w_sq1": rnd(ks[6], (1, c, 1, 1)),   "b_sq1": rnd(ks[7], (1,)),
        "w_sq2": rnd(ks[8], (1, c, 1, 1)),   "b_sq2": rnd(ks[9], (1,)),
        "w_conv_comb": rnd(ks[10], (1, 2, 1, 1)), "b_conv_comb": rnd(ks[11], (1,)),
        "w_adj1": rnd(ks[12], (1, 1, 3, 3)), "b_adj1": rnd(ks[13], (1,)),
        "w_adj2": rnd(ks[14], (1, 1, 3, 3)), "b_adj2": rnd(ks[15], (1,)),
        "bn1_gamma": 1.0 + rnd(ks[16], (c,), 0.1), "bn1_beta": rnd(ks[17], (c,), 0.1),
        "bn1_mean": rnd(ks[18], (c,), 0.1),
        "bn1_var": 1.0 + 0.2 * jax.random.uniform(ks[19], (c,), jnp.float32),
        "bn2_gamma": 1.0 + rnd(ks[20], (c,), 0.1), "bn2_beta": rnd(ks[21], (c,), 0.1),
        "bn2_mean": rnd(ks[22], (c,), 0.1),
        "bn2_var": 1.0 + 0.2 * jax.random.uniform(ks[23], (c,), jnp.float32),
    }


if __name__ == "__main__":
    key = jax.random.PRNGKey(0)
    k_p, k_x1, k_x2 = jax.random.split(key, 3)

    # n_channels_extract = 32 (module default), small spatial size.
    n, c, h, w = 2, 32, 16, 16
    params = init_params(k_p, c)
    x1 = jax.random.normal(k_x1, (n, c, h, w), jnp.float32)
    x2 = jax.random.normal(k_x2, (n, c, h, w), jnp.float32)

    out1, out2 = jax.jit(duse_attention)(x1, x2, params)
    jax.block_until_ready((out1, out2))

    ref1, ref2 = duse_reference(x1, x2, params)
    err1 = float(jnp.max(jnp.abs(out1 - ref1)))
    err2 = float(jnp.max(jnp.abs(out2 - ref2)))
    assert out1.shape == (n, c, h, w) and out2.shape == (n, c, h, w)
    assert bool(jnp.isfinite(out1).all()) and bool(jnp.isfinite(out2).all())
    assert err1 < 2e-3 and err2 < 2e-3, (err1, err2)
    print("KERNEL_OK")
</pallas_src>

<mosaic_0001>
module attributes {stable_mosaic.version = 11 : i64} {
  func.func @_duse_kernel(%arg0: i32, %arg1: memref<1x32x256xf32, #tpu.memory_space<vmem>>, %arg2: memref<1x32x256xf32, #tpu.memory_space<vmem>>, %arg3: memref<129x32xf32, #tpu.memory_space<vmem>>, %arg4: memref<32x8xf32, #tpu.memory_space<vmem>>, %arg5: memref<8x256xf32, #tpu.memory_space<vmem>>, %arg6: memref<25xf32, #tpu.memory_space<smem>>, %arg7: memref<1x32x256xf32, #tpu.memory_space<vmem>>, %arg8: memref<1x32x256xf32, #tpu.memory_space<vmem>>, %arg9: memref<1x256xf32, #tpu.memory_space<vmem>>, %arg10: memref<1x256xf32, #tpu.memory_space<vmem>>, %arg11: memref<1x256xf32, #tpu.memory_space<vmem>>) attributes {dimension_semantics = [#tpu.dimension_semantics<parallel>], iteration_bounds = array<i64: 2>, scalar_prefetch = 0 : i64, scratch_operands = 3 : i64, tpu.core_type = #tpu.core_type<tc>, window_params = [{transform_indices = @transform_0, window_bounds = array<i64: 1, 32, 256>}, {transform_indices = @transform_1, window_bounds = array<i64: 1, 32, 256>}, {pipeline_mode = #tpu.pipeline_mode<synchronous>, transform_indices = @transform_2, window_bounds = array<i64: 129, 32>}, {pipeline_mode = #tpu.pipeline_mode<synchronous>, transform_indices = @transform_3, window_bounds = array<i64: 32, 8>}, {pipeline_mode = #tpu.pipeline_mode<synchronous>, transform_indices = @transform_4, window_bounds = array<i64: 8, 256>}, {transform_indices = @transform_5, window_bounds = array<i64: 25>}, {transform_indices = @transform_6, window_bounds = array<i64: 1, 32, 256>}, {transform_indices = @transform_7, window_bounds = array<i64: 1, 32, 256>}]} {
    %c0 = arith.constant 0 : index
    %c0_0 = arith.constant 0 : index
    %0 = vector.load %arg3[%c0, %c0_0] : memref<129x32xf32, #tpu.memory_space<vmem>>, vector<129x32xf32>
    %1 = vector.extract_strided_slice %0 {offsets = [0, 0], sizes = [32, 32], strides = [1, 1]} : vector<129x32xf32> to vector<32x32xf32>
    %2 = vector.extract_strided_slice %0 {offsets = [32, 0], sizes = [32, 32], strides = [1, 1]} : vector<129x32xf32> to vector<32x32xf32>
    %3 = vector.extract_strided_slice %0 {offsets = [64, 0], sizes = [32, 32], strides = [1, 1]} : vector<129x32xf32> to vector<32x32xf32>
    %4 = vector.extract_strided_slice %0 {offsets = [96, 0], sizes = [32, 32], strides = [1, 1]} : vector<129x32xf32> to vector<32x32xf32>
    %5 = vector.extract_strided_slice %0 {offsets = [128, 0], sizes = [1, 32], strides = [1, 1]} : vector<129x32xf32> to vector<1x32xf32>
    %c0_1 = arith.constant 0 : index
    %c0_2 = arith.constant 0 : index
    %6 = vector.load %arg4[%c0_1, %c0_2] : memref<32x8xf32, #tpu.memory_space<vmem>>, vector<32x8xf32>
    %7 = vector.extract_strided_slice %6 {offsets = [0, 0], sizes = [32, 1], strides = [1, 1]} : vector<32x8xf32> to vector<32x1xf32>
    %8 = vector.extract_strided_slice %6 {offsets = [0, 1], sizes = [32, 1], strides = [1, 1]} : vector<32x8xf32> to vector<32x1xf32>
    %9 = vector.extract_strided_slice %6 {offsets = [0, 2], sizes = [32, 1], strides = [1, 1]} : vector<32x8xf32> to vector<32x1xf32>
    %10 = vector.extract_strided_slice %6 {offsets = [0, 3], sizes = [32, 1], strides = [1, 1]} : vector<32x8xf32> to vector<32x1xf32>
    %11 = vector.extract_strided_slice %6 {offsets = [0, 4], sizes = [32, 1], strides = [1, 1]} : vector<32x8xf32> to vector<32x1xf32>
    %12 = vector.extract_strided_slice %6 {offsets = [0, 5], sizes = [32, 1], strides = [1, 1]} : vector<32x8xf32> to vector<32x1xf32>
    %13 = vector.extract_strided_slice %6 {offsets = [0, 6], sizes = [32, 1], strides = [1, 1]} : vector<32x8xf32> to vector<32x1xf32>
    %14 = vector.extract_strided_slice %6 {offsets = [0, 7], sizes = [32, 1], strides = [1, 1]} : vector<32x8xf32> to vector<32x1xf32>
    %c0_3 = arith.constant 0 : index
    %c0_4 = arith.constant 0 : index
    %c0_5 = arith.constant 0 : index
    %15 = vector.load %arg1[%c0_3, %c0_4, %c0_5] : memref<1x32x256xf32, #tpu.memory_space<vmem>>, vector<1x32x256xf32>
    %16 = vector.shape_cast %15 : vector<1x32x256xf32> to vector<32x256xf32>
    %c0_6 = arith.constant 0 : index
    %c0_7 = arith.constant 0 : index
    %c0_8 = arith.constant 0 : index
    %17 = vector.load %arg2[%c0_6, %c0_7, %c0_8] : memref<1x32x256xf32, #tpu.memory_space<vmem>>, vector<1x32x256xf32>
    %18 = vector.shape_cast %17 : vector<1x32x256xf32> to vector<32x256xf32>
    %cst = arith.constant dense<0.000000e+00> : vector<32xf32>
    %19 = vector.multi_reduction <add>, %16, %cst [1] : vector<32x256xf32> to vector<32xf32>
    %20 = vector.shape_cast %19 : vector<32xf32> to vector<32x1xf32>
    %cst_9 = arith.constant 3.906250e-03 : f32
    %21 = vector.broadcast %cst_9 : f32 to vector<32x1xf32>
    %22 = arith.mulf %20, %21 : vector<32x1xf32>
    %cst_10 = arith.constant dense<0.000000e+00> : vector<32xf32>
    %23 = vector.multi_reduction <add>, %18, %cst_10 [1] : vector<32x256xf32> to vector<32xf32>
    %24 = vector.shape_cast %23 : vector<32xf32> to vector<32x1xf32>
    %cst_11 = arith.constant 3.906250e-03 : f32
    %25 = vector.broadcast %cst_11 : f32 to vector<32x1xf32>
    %26 = arith.mulf %24, %25 : vector<32x1xf32>
    %27 = vector.broadcast %22 : vector<32x1xf32> to vector<32x32xf32>
    %28 = arith.mulf %1, %27 : vector<32x32xf32>
    %cst_12 = arith.constant dense<0.000000e+00> : vector<32xf32>
    %29 = vector.multi_reduction <add>, %28, %cst_12 [0] : vector<32x32xf32> to vector<32xf32>
    %30 = vector.shape_cast %29 : vector<32xf32> to vector<1x32xf32>
    %31 = vector.broadcast %26 : vector<32x1xf32> to vector<32x32xf32>
    %32 = arith.mulf %2, %31 : vector<32x32xf32>
    %cst_13 = arith.constant dense<0.000000e+00> : vector<32xf32>
    %33 = vector.multi_reduction <add>, %32, %cst_13 [0] : vector<32x32xf32> to vector<32xf32>
    %34 = vector.shape_cast %33 : vector<32xf32> to vector<1x32xf32>
    %35 = arith.addf %30, %34 : vector<1x32xf32>
    %36 = arith.addf %35, %5 : vector<1x32xf32>
    %37 = vector.broadcast %36 : vector<1x32xf32> to vector<32x32xf32>
    %38 = arith.mulf %3, %37 : vector<32x32xf32>
    %cst_14 = arith.constant dense<0.000000e+00> : vector<32xf32>
    %39 = vector.multi_reduction <add>, %38, %cst_14 [1] : vector<32x32xf32> to vector<32xf32>
    %40 = vector.shape_cast %39 : vector<32xf32> to vector<32x1xf32>
    %41 = arith.addf %40, %7 : vector<32x1xf32>
    %cst_15 = arith.constant 0.000000e+00 : f32
    %42 = vector.broadcast %cst_15 : f32 to vector<32x1xf32>
    %43 = arith.subf %42, %41 : vector<32x1xf32>
    %44 = math.exp %43 : vector<32x1xf32>
    %cst_16 = arith.constant 1.000000e+00 : f32
    %45 = vector.broadcast %cst_16 : f32 to vector<32x1xf32>
    %46 = arith.addf %45, %44 : vector<32x1xf32>
    %cst_17 = arith.constant 1.000000e+00 : f32
    %47 = vector.broadcast %cst_17 : f32 to vector<32x1xf32>
    %48 = arith.divf %47, %46 : vector<32x1xf32>
    %49 = vector.broadcast %36 : vector<1x32xf32> to vector<32x32xf32>
    %50 = arith.mulf %4, %49 : vector<32x32xf32>
    %cst_18 = arith.constant dense<0.000000e+00> : vector<32xf32>
    %51 = vector.multi_reduction <add>, %50, %cst_18 [1] : vector<32x32xf32> to vector<32xf32>
    %52 = vector.shape_cast %51 : vector<32xf32> to vector<32x1xf32>
    %53 = arith.addf %52, %8 : vector<32x1xf32>
    %cst_19 = arith.constant 0.000000e+00 : f32
    %54 = vector.broadcast %cst_19 : f32 to vector<32x1xf32>
    %55 = arith.subf %54, %53 : vector<32x1xf32>
    %56 = math.exp %55 : vector<32x1xf32>
    %cst_20 = arith.constant 1.000000e+00 : f32
    %57 = vector.broadcast %cst_20 : f32 to vector<32x1xf32>
    %58 = arith.addf %57, %56 : vector<32x1xf32>
    %cst_21 = arith.constant 1.000000e+00 : f32
    %59 = vector.broadcast %cst_21 : f32 to vector<32x1xf32>
    %60 = arith.divf %59, %58 : vector<32x1xf32>
    %61 = vector.broadcast %9 : vector<32x1xf32> to vector<32x256xf32>
    %62 = arith.mulf %16, %61 : vector<32x256xf32>
    %cst_22 = arith.constant dense<0.000000e+00> : vector<256xf32>
    %63 = vector.multi_reduction <add>, %62, %cst_22 [0] : vector<32x256xf32> to vector<256xf32>
    %64 = vector.shape_cast %63 : vector<256xf32> to vector<1x256xf32>
    %c0_23 = arith.constant 0 : index
    %65 = memref.load %arg6[%c0_23] : memref<25xf32, #tpu.memory_space<smem>>
    %66 = vector.broadcast %65 : f32 to vector<1x256xf32>
    %67 = arith.addf %64, %66 : vector<1x256xf32>
    %68 = vector.broadcast %10 : vector<32x1xf32> to vector<32x256xf32>
    %69 = arith.mulf %18, %68 : vector<32x256xf32>
    %cst_24 = arith.constant dense<0.000000e+00> : vector<256xf32>
    %70 = vector.multi_reduction <add>, %69, %cst_24 [0] : vector<32x256xf32> to vector<256xf32>
    %71 = vector.shape_cast %70 : vector<256xf32> to vector<1x256xf32>
    %c1 = arith.constant 1 : index
    %72 = memref.load %arg6[%c1] : memref<25xf32, #tpu.memory_space<smem>>
    %73 = vector.broadcast %72 : f32 to vector<1x256xf32>
    %74 = arith.addf %71, %73 : vector<1x256xf32>
    %c2 = arith.constant 2 : index
    %75 = memref.load %arg6[%c2] : memref<25xf32, #tpu.memory_space<smem>>
    %76 = vector.broadcast %75 : f32 to vector<1x256xf32>
    %77 = arith.mulf %76, %67 : vector<1x256xf32>
    %c3 = arith.constant 3 : index
    %78 = memref.load %arg6[%c3] : memref<25xf32, #tpu.memory_space<smem>>
    %79 = vector.broadcast %78 : f32 to vector<1x256xf32>
    %80 = arith.mulf %79, %74 : vector<1x256xf32>
    %81 = arith.addf %77, %80 : vector<1x256xf32>
    %c4 = arith.constant 4 : index
    %82 = memref.load %arg6[%c4] : memref<25xf32, #tpu.memory_space<smem>>
    %83 = vector.broadcast %82 : f32 to vector<1x256xf32>
    %84 = arith.addf %81, %83 : vector<1x256xf32>
    %c0_25 = arith.constant 0 : index
    %c0_26 = arith.constant 0 : index
    %85 = vector.load %arg9[%c0_25, %c0_26] : memref<1x256xf32, #tpu.memory_space<vmem>>, vector<1x256xf32>
    tpu.vector_store %arg9[%c0_25, %c0_26], %84 {strides = array<i32>} : memref<1x256xf32, #tpu.memory_space<vmem>>, vector<1x256xf32>,
    %c0_27 = arith.constant 0 : index
    %c0_28 = arith.constant 0 : index
    %86 = vector.load %arg9[%c0_27, %c0_28] : memref<1x256xf32, #tpu.memory_space<vmem>>, vector<1x256xf32>
    %c0_29 = arith.constant 0 : index
    %c0_30 = arith.constant 0 : index
    %87 = vector.load %arg5[%c0_29, %c0_30] : memref<8x256xf32, #tpu.memory_space<vmem>>, vector<8x256xf32>
    %c9 = arith.constant 9 : index
    %88 = memref.load %arg6[%c9] : memref<25xf32, #tpu.memory_space<smem>>
    %89 = vector.broadcast %88 : f32 to vector<1x256xf32>
    %90 = arith.mulf %89, %86 : vector<1x256xf32>
    %c14 = arith.constant 14 : index
    %91 = memref.load %arg6[%c14] : memref<25xf32, #tpu.memory_space<smem>>
    %92 = vector.broadcast %91 : f32 to vector<1x256xf32>
    %93 = arith.addf %90, %92 : vector<1x256xf32>
    %c19 = arith.constant 19 : index
    %94 = memref.load %arg6[%c19] : memref<25xf32, #tpu.memory_space<smem>>
    %95 = vector.broadcast %94 : f32 to vector<1x256xf32>
    %96 = arith.mulf %95, %86 : vector<1x256xf32>
    %c24 = arith.constant 24 : index
    %97 = memref.load %arg6[%c24] : memref<25xf32, #tpu.memory_space<smem>>
    %98 = vector.broadcast %97 : f32 to vector<1x256xf32>
    %99 = arith.addf %96, %98 : vector<1x256xf32>
    %c17_i32 = arith.constant 17 : i32
    %100 = tpu.dynamic_rotate %86 by %c17_i32 dim 1 : vector<1x256xf32>, i32 -> vector<1x256xf32>
    %101 = vector.extract_strided_slice %87 {offsets = [0, 0], sizes = [1, 256], strides = [1, 1]} : vector<8x256xf32> to vector<1x256xf32>
    %102 = arith.mulf %100, %101 : vector<1x256xf32>
    %c5 = arith.constant 5 : index
    %103 = memref.load %arg6[%c5] : memref<25xf32, #tpu.memory_space<smem>>
    %104 = vector.broadcast %103 : f32 to vector<1x256xf32>
    %105 = arith.mulf %104, %102 : vector<1x256xf32>
    %106 = arith.addf %93, %105 : vector<1x256xf32>
    %c15 = arith.constant 15 : index
    %107 = memref.load %arg6[%c15] : memref<25xf32, #tpu.memory_space<smem>>
    %108 = vector.broadcast %107 : f32 to vector<1x256xf32>
    %109 = arith.mulf %108, %102 : vector<1x256xf32>
    %110 = arith.addf %99, %109 : vector<1x256xf32>
    %c16_i32 = arith.constant 16 : i32
    %111 = tpu.dynamic_rotate %86 by %c16_i32 dim 1 : vector<1x256xf32>, i32 -> vector<1x256xf32>
    %112 = vector.extract_strided_slice %87 {offsets = [1, 0], sizes = [1, 256], strides = [1, 1]} : vector<8x256xf32> to vector<1x256xf32>
    %113 = arith.mulf %111, %112 : vector<1x256xf32>
    %c6 = arith.constant 6 : index
    %114 = memref.load %arg6[%c6] : memref<25xf32, #tpu.memory_space<smem>>
    %115 = vector.broadcast %114 : f32 to vector<1x256xf32>
    %116 = arith.mulf %115, %113 : vector<1x256xf32>
    %117 = arith.addf %106, %116 : vector<1x256xf32>
    %c16 = arith.constant 16 : index
    %118 = memref.load %arg6[%c16] : memref<25xf32, #tpu.memory_space<smem>>
    %119 = vector.broadcast %118 : f32 to vector<1x256xf32>
    %120 = arith.mulf %119, %113 : vector<1x256xf32>
    %121 = arith.addf %110, %120 : vector<1x256xf32>
    %c15_i32 = arith.constant 15 : i32
    %122 = tpu.dynamic_rotate %86 by %c15_i32 dim 1 : vector<1x256xf32>, i32 -> vector<1x256xf32>
    %123 = vector.extract_strided_slice %87 {offsets = [2, 0], sizes = [1, 256], strides = [1, 1]} : vector<8x256xf32> to vector<1x256xf32>
    %124 = arith.mulf %122, %123 : vector<1x256xf32>
    %c7 = arith.constant 7 : index
    %125 = memref.load %arg6[%c7] : memref<25xf32, #tpu.memory_space<smem>>
    %126 = vector.broadcast %125 : f32 to vector<1x256xf32>
    %127 = arith.mulf %126, %124 : vector<1x256xf32>
    %128 = arith.addf %117, %127 : vector<1x256xf32>
    %c17 = arith.constant 17 : index
    %129 = memref.load %arg6[%c17] : memref<25xf32, #tpu.memory_space<smem>>
    %130 = vector.broadcast %129 : f32 to vector<1x256xf32>
    %131 = arith.mulf %130, %124 : vector<1x256xf32>
    %132 = arith.addf %121, %131 : vector<1x256xf32>
    %c1_i32 = arith.constant 1 : i32
    %133 = tpu.dynamic_rotate %86 by %c1_i32 dim 1 : vector<1x256xf32>, i32 -> vector<1x256xf32>
    %134 = vector.extract_strided_slice %87 {offsets = [3, 0], sizes = [1, 256], strides = [1, 1]} : vector<8x256xf32> to vector<1x256xf32>
    %135 = arith.mulf %133, %134 : vector<1x256xf32>
    %c8 = arith.constant 8 : index
    %136 = memref.load %arg6[%c8] : memref<25xf32, #tpu.memory_space<smem>>
    %137 = vector.broadcast %136 : f32 to vector<1x256xf32>
    %138 = arith.mulf %137, %135 : vector<1x256xf32>
    %139 = arith.addf %128, %138 : vector<1x256xf32>
    %c18 = arith.constant 18 : index
    %140 = memref.load %arg6[%c18] : memref<25xf32, #tpu.memory_space<smem>>
    %141 = vector.broadcast %140 : f32 to vector<1x256xf32>
    %142 = arith.mulf %141, %135 : vector<1x256xf32>
    %143 = arith.addf %132, %142 : vector<1x256xf32>
    %c255_i32 = arith.constant 255 : i32
    %144 = tpu.dynamic_rotate %86 by %c255_i32 dim 1 : vector<1x256xf32>, i32 -> vector<1x256xf32>
    %145 = vector.extract_strided_slice %87 {offsets = [4, 0], sizes = [1, 256], strides = [1, 1]} : vector<8x256xf32> to vector<1x256xf32>
    %146 = arith.mulf %144, %145 : vector<1x256xf32>
    %c10 = arith.constant 10 : index
    %147 = memref.load %arg6[%c10] : memref<25xf32, #tpu.memory_space<smem>>
    %148 = vector.broadcast %147 : f32 to vector<1x256xf32>
    %149 = arith.mulf %148, %146 : vector<1x256xf32>
    %150 = arith.addf %139, %149 : vector<1x256xf32>
    %c20 = arith.constant 20 : index
    %151 = memref.load %arg6[%c20] : memref<25xf32, #tpu.memory_space<smem>>
    %152 = vector.broadcast %151 : f32 to vector<1x256xf32>
    %153 = arith.mulf %152, %146 : vector<1x256xf32>
    %154 = arith.addf %143, %153 : vector<1x256xf32>
    %c241_i32 = arith.constant 241 : i32
    %155 = tpu.dynamic_rotate %86 by %c241_i32 dim 1 : vector<1x256xf32>, i32 -> vector<1x256xf32>
    %156 = vector.extract_strided_slice %87 {offsets = [5, 0], sizes = [1, 256], strides = [1, 1]} : vector<8x256xf32> to vector<1x256xf32>
    %157 = arith.mulf %155, %156 : vector<1x256xf32>
    %c11 = arith.constant 11 : index
    %158 = memref.load %arg6[%c11] : memref<25xf32, #tpu.memory_space<smem>>
    %159 = vector.broadcast %158 : f32 to vector<1x256xf32>
    %160 = arith.mulf %159, %157 : vector<1x256xf32>
    %161 = arith.addf %150, %160 : vector<1x256xf32>
    %c21 = arith.constant 21 : index
    %162 = memref.load %arg6[%c21] : memref<25xf32, #tpu.memory_space<smem>>
    %163 = vector.broadcast %162 : f32 to vector<1x256xf32>
    %164 = arith.mulf %163, %157 : vector<1x256xf32>
    %165 = arith.addf %154, %164 : vector<1x256xf32>
    %c240_i32 = arith.constant 240 : i32
    %166 = tpu.dynamic_rotate %86 by %c240_i32 dim 1 : vector<1x256xf32>, i32 -> vector<1x256xf32>
    %167 = vector.extract_strided_slice %87 {offsets = [6, 0], sizes = [1, 256], strides = [1, 1]} : vector<8x256xf32> to vector<1x256xf32>
    %168 = arith.mulf %166, %167 : vector<1x256xf32>
    %c12 = arith.constant 12 : index
    %169 = memref.load %arg6[%c12] : memref<25xf32, #tpu.memory_space<smem>>
    %170 = vector.broadcast %169 : f32 to vector<1x256xf32>
    %171 = arith.mulf %170, %168 : vector<1x256xf32>
    %172 = arith.addf %161, %171 : vector<1x256xf32>
    %c22 = arith.constant 22 : index
    %173 = memref.load %arg6[%c22] : memref<25xf32, #tpu.memory_space<smem>>
    %174 = vector.broadcast %173 : f32 to vector<1x256xf32>
    %175 = arith.mulf %174, %168 : vector<1x256xf32>
    %176 = arith.addf %165, %175 : vector<1x256xf32>
    %c239_i32 = arith.constant 239 : i32
    %177 = tpu.dynamic_rotate %86 by %c239_i32 dim 1 : vector<1x256xf32>, i32 -> vector<1x256xf32>
    %178 = vector.extract_strided_slice %87 {offsets = [7, 0], sizes = [1, 256], strides = [1, 1]} : vector<8x256xf32> to vector<1x256xf32>
    %179 = arith.mulf %177, %178 : vector<1x256xf32>
    %c13 = arith.constant 13 : index
    %180 = memref.load %arg6[%c13] : memref<25xf32, #tpu.memory_space<smem>>
    %181 = vector.broadcast %180 : f32 to vector<1x256xf32>
    %182 = arith.mulf %181, %179 : vector<1x256xf32>
    %183 = arith.addf %172, %182 : vector<1x256xf32>
    %c23 = arith.constant 23 : index
    %184 = memref.load %arg6[%c23] : memref<25xf32, #tpu.memory_space<smem>>
    %185 = vector.broadcast %184 : f32 to vector<1x256xf32>
    %186 = arith.mulf %185, %179 : vector<1x256xf32>
    %187 = arith.addf %176, %186 : vector<1x256xf32>
    %cst_31 = arith.constant 0.000000e+00 : f32
    %188 = vector.broadcast %cst_31 : f32 to vector<1x256xf32>
    %189 = arith.subf %188, %183 : vector<1x256xf32>
    %190 = math.exp %189 : vector<1x256xf32>
    %cst_32 = arith.constant 1.000000e+00 : f32
    %191 = vector.broadcast %cst_32 : f32 to vector<1x256xf32>
    %192 = arith.addf %191, %190 : vector<1x256xf32>
    %cst_33 = arith.constant 1.000000e+00 : f32
    %193 = vector.broadcast %cst_33 : f32 to vector<1x256xf32>
    %194 = arith.divf %193, %192 : vector<1x256xf32>
    %c0_34 = arith.constant 0 : index
    %c0_35 = arith.constant 0 : index
    %195 = vector.load %arg10[%c0_34, %c0_35] : memref<1x256xf32, #tpu.memory_space<vmem>>, vector<1x256xf32>
    tpu.vector_store %arg10[%c0_34, %c0_35], %194 {strides = array<i32>} : memref<1x256xf32, #tpu.memory_space<vmem>>, vector<1x256xf32>,
    %cst_36 = arith.constant 0.000000e+00 : f32
    %196 = vector.broadcast %cst_36 : f32 to vector<1x256xf32>
    %197 = arith.subf %196, %187 : vector<1x256xf32>
    %198 = math.exp %197 : vector<1x256xf32>
    %cst_37 = arith.constant 1.000000e+00 : f32
    %199 = vector.broadcast %cst_37 : f32 to vector<1x256xf32>
    %200 = arith.addf %199, %198 : vector<1x256xf32>
    %cst_38 = arith.constant 1.000000e+00 : f32
    %201 = vector.broadcast %cst_38 : f32 to vector<1x256xf32>
    %202 = arith.divf %201, %200 : vector<1x256xf32>
    %c0_39 = arith.constant 0 : index
    %c0_40 = arith.constant 0 : index
    %203 = vector.load %arg11[%c0_39, %c0_40] : memref<1x256xf32, #tpu.memory_space<vmem>>, vector<1x256xf32>
    tpu.vector_store %arg11[%c0_39, %c0_40], %202 {strides = array<i32>} : memref<1x256xf32, #tpu.memory_space<vmem>>, vector<1x256xf32>,
    %c0_41 = arith.constant 0 : index
    %c0_42 = arith.constant 0 : index
    %c0_43 = arith.constant 0 : index
    %204 = vector.load %arg1[%c0_41, %c0_42, %c0_43] : memref<1x32x256xf32, #tpu.memory_space<vmem>>, vector<1x32x256xf32>
    %205 = vector.shape_cast %204 : vector<1x32x256xf32> to vector<32x256xf32>
    %c0_44 = arith.constant 0 : index
    %c0_45 = arith.constant 0 : index
    %c0_46 = arith.constant 0 : index
    %206 = vector.load %arg2[%c0_44, %c0_45, %c0_46] : memref<1x32x256xf32, #tpu.memory_space<vmem>>, vector<1x32x256xf32>
    %207 = vector.shape_cast %206 : vector<1x32x256xf32> to vector<32x256xf32>
    %c0_47 = arith.constant 0 : index
    %c0_48 = arith.constant 0 : index
    %208 = vector.load %arg10[%c0_47, %c0_48] : memref<1x256xf32, #tpu.memory_space<vmem>>, vector<1x256xf32>
    %c0_49 = arith.constant 0 : index
    %c0_50 = arith.constant 0 : index
    %209 = vector.load %arg11[%c0_49, %c0_50] : memref<1x256xf32, #tpu.memory_space<vmem>>, vector<1x256xf32>
    %cst_51 = arith.constant 1.000000e+00 : f32
    %210 = vector.broadcast %cst_51 : f32 to vector<32x1xf32>
    %211 = arith.addf %210, %48 : vector<32x1xf32>
    %212 = vector.broadcast %211 : vector<32x1xf32> to vector<32x256xf32>
    %213 = vector.broadcast %208 : vector<1x256xf32> to vector<32x256xf32>
    %214 = arith.addf %212, %213 : vector<32x256xf32>
    %215 = arith.mulf %205, %214 : vector<32x256xf32>
    %216 = vector.broadcast %11 : vector<32x1xf32> to vector<32x256xf32>
    %217 = arith.mulf %215, %216 : vector<32x256xf32>
    %218 = vector.broadcast %12 : vector<32x1xf32> to vector<32x256xf32>
    %219 = arith.addf %217, %218 : vector<32x256xf32>
    %c0_52 = arith.constant 0 : index
    %c0_53 = arith.constant 0 : index
    %c0_54 = arith.constant 0 : index
    %220 = vector.load %arg7[%c0_52, %c0_53, %c0_54] : memref<1x32x256xf32, #tpu.memory_space<vmem>>, vector<1x32x256xf32>
    %221 = vector.shape_cast %220 : vector<1x32x256xf32> to vector<32x256xf32>
    %222 = vector.shape_cast %219 : vector<32x256xf32> to vector<1x32x256xf32>
    tpu.vector_store %arg7[%c0_52, %c0_53, %c0_54], %222 {strides = array<i32>} : memref<1x32x256xf32, #tpu.memory_space<vmem>>, vector<1x32x256xf32>,
    %cst_55 = arith.constant 1.000000e+00 : f32
    %223 = vector.broadcast %cst_55 : f32 to vector<32x1xf32>
    %224 = arith.addf %223, %60 : vector<32x1xf32>
    %225 = vector.broadcast %224 : vector<32x1xf32> to vector<32x256xf32>
    %226 = vector.broadcast %209 : vector<1x256xf32> to vector<32x256xf32>
    %227 = arith.addf %225, %226 : vector<32x256xf32>
    %228 = arith.mulf %207, %227 : vector<32x256xf32>
    %229 = vector.broadcast %13 : vector<32x1xf32> to vector<32x256xf32>
    %230 = arith.mulf %228, %229 : vector<32x256xf32>
    %231 = vector.broadcast %14 : vector<32x1xf32> to vector<32x256xf32>
    %232 = arith.addf %230, %231 : vector<32x256xf32>
    %c0_56 = arith.constant 0 : index
    %c0_57 = arith.constant 0 : index
    %c0_58 = arith.constant 0 : index
    %233 = vector.load %arg8[%c0_56, %c0_57, %c0_58] : memref<1x32x256xf32, #tpu.memory_space<vmem>>, vector<1x32x256xf32>
    %234 = vector.shape_cast %233 : vector<1x32x256xf32> to vector<32x256xf32>
    %235 = vector.shape_cast %232 : vector<32x256xf32> to vector<1x32x256xf32>
    tpu.vector_store %arg8[%c0_56, %c0_57, %c0_58], %235 {strides = array<i32>} : memref<1x32x256xf32, #tpu.memory_space<vmem>>, vector<1x32x256xf32>,
    return
  }
  func.func @transform_0(%arg0: i32) -> (i32, i32, i32) {
    %c0_i32 = arith.constant 0 : i32
    %c0_i32_0 = arith.constant 0 : i32
    %c0_i32_1 = arith.constant 0 : i32
    return %arg0, %c0_i32, %c0_i32_0 : i32, i32, i32
  }
  func.func @transform_1(%arg0: i32) -> (i32, i32, i32) {
    %c0_i32 = arith.constant 0 : i32
    %c0_i32_0 = arith.constant 0 : i32
    %c0_i32_1 = arith.constant 0 : i32
    return %arg0, %c0_i32, %c0_i32_0 : i32, i32, i32
  }
  func.func @transform_2(%arg0: i32) -> (i32, i32) {
    %c0_i32 = arith.constant 0 : i32
    %c0_i32_0 = arith.constant 0 : i32
    %c0_i32_1 = arith.constant 0 : i32
    return %c0_i32, %c0_i32_0 : i32, i32
  }
  func.func @transform_3(%arg0: i32) -> (i32, i32) {
    %c0_i32 = arith.constant 0 : i32
    %c0_i32_0 = arith.constant 0 : i32
    %c0_i32_1 = arith.constant 0 : i32
    return %c0_i32, %c0_i32_0 : i32, i32
  }
  func.func @transform_4(%arg0: i32) -> (i32, i32) {
    %c0_i32 = arith.constant 0 : i32
    %c0_i32_0 = arith.constant 0 : i32
    %c0_i32_1 = arith.constant 0 : i32
    return %c0_i32, %c0_i32_0 : i32, i32
  }
  func.func @transform_5(%arg0: i32) -> i32 {
    %c0_i32 = arith.constant 0 : i32
    %c0_i32_0 = arith.constant 0 : i32
    return %c0_i32 : i32
  }
  func.func @transform_6(%arg0: i32) -> (i32, i32, i32) {
    %c0_i32 = arith.constant 0 : i32
    %c0_i32_0 = arith.constant 0 : i32
    %c0_i32_1 = arith.constant 0 : i32
    return %arg0, %c0_i32, %c0_i32_0 : i32, i32, i32
  }
  func.func @transform_7(%arg0: i32) -> (i32, i32, i32) {
    %c0_i32 = arith.constant 0 : i32
    %c0_i32_0 = arith.constant 0 : i32
    %c0_i32_1 = arith.constant 0 : i32
    return %arg0, %c0_i32, %c0_i32_0 : i32, i32, i32
  }
}

</mosaic_0001>

<bundles_post_ra>
// kernel: duse_attention.1
= control target key start
LH: loop header
LB: loop body
LE: loop exit
PB: predicated region body
PF: predicated region fallthrough
CT: control target
= control target key end

     0   :  { %13 = vsyncpa [#allocation6], 0  ;;  %s1742_s24 = smov 0   ;;  %s2398_s0 = inlined_call_operand.vmem [shape: f32[2,32,256], index: 0, kind: input, shape index: {}]   ;;  %s2399_s1 = inlined_call_operand.vmem [shape: f32[2,32,256], index: 1, kind: input, shape index: {}]   ;;  %s2400_s2 = inlined_call_operand.vmem [shape: f32[129,32], index: 2, kind: input, shape index: {}]   ;;  %s2401_s3 = inlined_call_operand.vmem [shape: f32[32,8], index: 3, kind: input, shape index: {}]   ;;  %s2402_s4 = inlined_call_operand.vmem [shape: f32[8,256], index: 4, kind: input, shape index: {}]   ;;  %s2403_s5 = inlined_call_operand.vmem [shape: f32[25], index: 5, kind: input, shape index: {}]   ;;  %s2404_s6 = inlined_call_operand.vmem [shape: f32[2,32,256], index: 6, kind: output, shape index: {0}]   ;;  %s2405_s7 = inlined_call_operand.vmem [shape: f32[2,32,256], index: 7, kind: output, shape index: {1}]  }
   0x1 LB: > { %s1513_s25 = sadd.s32 4294967295, %s1682_s24   ;;  %p1515_p0 = scmp.ge.s32.totalorder %s1682_s24, 1  ;;  %s1682_s24 = sphi %s1742_s24, %s19_s24  }
   0x2   : > { %p212_p1 = scmp.lt.s32.totalorder %s1682_s24, 3  ;;  %s234_s28 = sshll.u32 %s2403_s5, 4  ;;  %s235_s28 = int_to_ptr.vmem [resolvable:$true] %s234_s28 }
   0x3   : > { %p1566_p3 = scmp.eq.s32.totalorder %s1513_s25, 0  ;;  %s1657_s30 = scalar_lea.vmem %s235_s28, 16 }
   0x4   : > { %p1753_p2 = pnand %p1515_p0, %p212_p1  ;;  %p1658_p6 = scmp.ne.s32.totalorder %s235_s28, %s1657_s30 }
   0x5   : > { %p1665_p10 = scmp.lt.s32.totalorder %s235_s28, %s235_s28  ;;  %p1666_p11 = scmp.lt.s32.totalorder %s1657_s30, %s1657_s30 }
   0x6   : > { %p1562_p4 = pneg %p1753_p2 }
   0x7   : > { %p1667_p12 = por %p1666_p11, %p1665_p10 }
   0x8   : > { %p1563_p5 = pnand %p1566_p3, %p1562_p4 }
   0xa   : > { %p1659_p7 = pneg %p1563_p5 }
   0xc   : > { %p1660_p8 = pnand %p1659_p7, %p1658_p6 }
   0xe   : > { %p1661_p9 = pneg %p1660_p8 }
  0x10   : > { %p1668_p13 = pnand %p1667_p12, %p1661_p9 }
  0x12   : > { %1671 = shalt.err (!%p1668_p13)
}
  0x13   : > { %s1684_s8 = smov [#allocation5]   ;;  %263 = sbr.rel (%p1753_p2) target bundleno = 643 (0x283), region = 44 }
  0x14   : > { %1565 = dma.vmem_to_smem (!%p1563_p5), %s235_s28, 16, %s1684_s8, [#allocation6]  }
  0x1a   : > { %1677 = dma.done.wait (%p1566_p3), [#allocation6], 16  }
  0x1b   : > { %1679 = vsyncadd (%p1566_p3), [#allocation6], 4294967280 }
  0x1c   : > { %269 = sfence }
  0x1d   : > { %p306_p0 = scmp.lt.s32.totalorder %s1513_s25, 1  ;;  %v1685_v0 = vmov 2   ;;  %v1845_v25 = vld [vmem:[%s2401_s3 + $0x8] sm:$0xff]  ;;  %v1851_v26 = vld [vmem:[%s2401_s3] sm:$0xff]  ;;  %v1686_v27 = vmov 3   ;;  %v1859_v28 = vld [vmem:[%s2401_s3 + $0x10] sm:$0xff] }
  0x1e   : > { %1595 = vset.pattern.permute.xlu1 %v1685_v0  ;;  %1594 = vset.pattern.permute.xlu0 %v1685_v0  ;;  %v1866_v29 = vld [vmem:[%s2401_s3 + $0x18] sm:$0xff]  ;;  %v330_v32 = vld [vmem:[%s2400_s2 + $0x20] sm:$0xff]  ;;  %v331_v33 = vld [vmem:[%s2400_s2 + $0x28] sm:$0xff]  ;;  %vm399_vm0 = vcmask 261120   ;;  %s1912_s11 = sld [smem:[#allocation5]]  ;;  %s1914_s13 = sld [smem:[#allocation5 + $0x2]] }
  0x1f   : > { %s2410_s25 = smov (!%p306_p0, %s1513_s25), 1  ;;  %v332_v38 = vld [vmem:[%s2400_s2 + $0x30] sm:$0xff]  ;;  %v333_v46 = vld [vmem:[%s2400_s2 + $0x38] sm:$0xff]  ;;  %s1916_s14 = sld [smem:[#allocation5 + $0x1]] }
  0x20   : > { %s1764_s9 = sshll.u32 %s2410_s25, 6  ;;  %s1918_s16 = sld [smem:[#allocation5 + $0x3]] }
  0x21   : > { %s1770_s12 = scalar_lea.vmem %s2399_s1, %s1764_s9  ;;  %s1776_s15 = scalar_lea.vmem %s2398_s0, %s1764_s9 }
  0x22   : > { %v1779_v1 = vld [vmem:[%s1770_s12] sm:$0xff]  ;;  %v1782_v2 = vld [vmem:[%s1770_s12 + $0x8] sm:$0xff]  ;;  %v1793_v6 = vld [vmem:[%s1770_s12 + $0x10] sm:$0xff]  ;;  %s1920_s17 = sld [smem:[#allocation5 + $0x4]]  ;;  %s1688_s27 = smov 17  }
  0x23   : > { %v1785_v3 = vld [vmem:[%s1776_s15] sm:$0xff]  ;;  %v379_v4 = vadd.f32 %v1782_v2, %v1779_v1  ;;  %v1790_v5 = vld [vmem:[%s1776_s15 + $0x8] sm:$0xff]  ;;  %v1796_v7 = vld [vmem:[%s1770_s12 + $0x18] sm:$0xff]  ;;  %s1689_s28 = smov 16   ;;  %s1691_s29 = smov 15  }
  0x24   : > { %v363_v8 = vadd.f32 %v1790_v5, %v1785_v3  ;;  %v1801_v9 = vld [vmem:[%s1776_s15 + $0x10] sm:$0xff]  ;;  %v1804_v10 = vld [vmem:[%s1776_s15 + $0x18] sm:$0xff]  ;;  %v382_v11 = vadd.f32 %v1796_v7, %v1793_v6  ;;  %v1811_v13 = vld [vmem:[%s1770_s12 + $0x20] sm:$0xff]  ;;  %s1692_s30 = smov 1   ;;  %s1693_s8 = smov 127  }
  0x25   : > { %380 = vadd.xlane.f32.xlu1 %v379_v4  ;;  %v366_v12 = vadd.f32 %v1804_v10, %v1801_v9  ;;  %v1814_v14 = vld [vmem:[%s1770_s12 + $0x28] sm:$0xff]  ;;  %v1817_v15 = vld [vmem:[%s1776_s15 + $0x20] sm:$0xff]  ;;  %v1827_v19 = vld [vmem:[%s1770_s12 + $0x30] sm:$0xff]  ;;  %s1694_s10 = smov 113   ;;  %s2047_s18 = sld [smem:[#allocation5 + $0x5]] }
  0x26   : > { %364 = vadd.xlane.f32.xlu0 %v363_v8  ;;  %v1820_v16 = vld [vmem:[%s1776_s15 + $0x28] sm:$0xff]  ;;  %v385_v17 = vadd.f32 %v1814_v14, %v1811_v13  ;;  %v1830_v20 = vld [vmem:[%s1770_s12 + $0x38] sm:$0xff]  ;;  %v1833_v21 = vld [vmem:[%s1776_s15 + $0x30] sm:$0xff]  ;;  %s2049_s19 = sld [smem:[#allocation5 + $0xf]]  ;;  %s2054_s20 = sld [smem:[#allocation5 + $0x6]] }
  0x27   : > { %v369_v18 = vadd.f32 %v1820_v16, %v1817_v15  ;;  %v1836_v22 = vld [vmem:[%s1776_s15 + $0x38] sm:$0xff]  ;;  %v388_v23 = vadd.f32 %v1830_v20, %v1827_v19  ;;  %s2056_s21 = sld [smem:[#allocation5 + $0x10]]  ;;  %s2058_s22 = sld [smem:[#allocation5 + $0x7]] }
  0x28   : > { %v372_v24 = vadd.f32 %v1836_v22, %v1833_v21  ;;  %s2061_s23 = sld [smem:[#allocation5 + $0x11]]  ;;  %s2065_s25 = sld [smem:[#allocation5 + $0x8]] }
  0x29   : > { %383 = vadd.xlane.f32.xlu1 %v382_v11  ;;  %s2067_s26 = sld [smem:[#allocation5 + $0x12]] }
  0x2a   : > { %367 = vadd.xlane.f32.xlu0 %v366_v12 }
  0x2d   : > { %386 = vadd.xlane.f32.xlu1 %v385_v17 }
  0x2e   : > { %370 = vadd.xlane.f32.xlu0 %v369_v18 }
  0x31   : > { %389 = vadd.xlane.f32.xlu1 %v388_v23 }
  0x32   : > { %373 = vadd.xlane.f32.xlu0 %v372_v24 }
  0x42   : > { %531 = vperm.xlu1 %1595, %v1845_v25  }
  0x46   : > { %1596 = vset.pattern.permute.xlu1 %v1686_v27 }
  0x47   : > { %575 = vperm.xlu1 %1596, %v1851_v26  }
  0x48   : > { %526 = vperm.xlu0 %1594, %v1851_v26  }
  0x4b   : > { %579 = vperm.xlu1 %1596, %v1845_v25  }
  0x4f   : > { %1597 = vset.pattern.permute.xlu1 %v1685_v0 }
  0x50   : > { %536 = vperm.xlu1 %1597, %v1859_v28  }
  0x54   : > { %1598 = vset.pattern.permute.xlu1 %v1686_v27 }
  0x55   : > { %583 = vperm.xlu1 %1598, %v1859_v28  }
  0x59   : > { %1599 = vset.pattern.permute.xlu1 %v1685_v0 }
  0x5a   : > { %541 = vperm.xlu1 %1599, %v1866_v29  }
  0x5e   : > { %1600 = vset.pattern.permute.xlu1 %v1686_v27 }
  0x5f   : > { %587 = vperm.xlu1 %1600, %v1866_v29  }
  0xb2   : > { %v381_v30 = vpop.xlane.xlu1 %380 }
  0xb3   : > { %v391_v31 = vmul.f32 0.00390625, %v381_v30  ;;  %v1880_v41 = vpop.xlane.xlu0 %364 }
  0xb5   : > { %v413_v35 = vmul.f32 %v391_v31, %v330_v32 }
  0xb6   : > { %v384_v34 = vpop.xlane.xlu1 %383 }
  0xb7   : > { %v392_v36 = vmul.f32 0.00390625, %v384_v34  ;;  %v417_v40 = vsel %vm399_vm0, %v413_v35, 0.0  ;;  %v1887_v51 = vpop.xlane.xlu0 %367 }
  0xb9   : > { %v414_v37 = vmul.f32 %v392_v36, %v331_v33 }
  0xba   : > { %v387_v39 = vpop.xlane.xlu1 %386 }
  0xbb   : > { %v418_v42 = vsel %vm399_vm0, %v414_v37, 0.0  ;;  %v393_v43 = vmul.f32 0.00390625, %v387_v39  ;;  %v1892_v57 = vpop.xlane.xlu0 %370 }
  0xbc   : > { %v419_v44 = vadd.f32 %v418_v42, %v417_v40 }
  0xbd   : > { %v415_v45 = vmul.f32 %v393_v43, %v332_v38 }
  0xbe   : > { %v390_v47 = vpop.xlane.xlu1 %389 }
  0xbf   : > { %v420_v48 = vsel %vm399_vm0, %v415_v45, 0.0  ;;  %v394_v49 = vmul.f32 0.00390625, %v390_v47  ;;  %v1894_v59 = vpop.xlane.xlu0 %373 }
  0xc0   : > { %v421_v50 = vadd.f32 %v420_v48, %v419_v44 }
  0xc1   : > { %v416_v52 = vmul.f32 %v394_v49, %v333_v46 }
  0xc2   : > { %v532_v53 = vpop.permute.xlu1 %531 }
  0xc3   : > { %v422_v54 = vsel %vm399_vm0, %v416_v52, 0.0  ;;  %v546_v4 = vmul.f32 %v532_v53, %v1801_v9  ;;  %v547_v8 = vmul.f32 %v532_v53, %v1804_v10 }
  0xc4   : > { %v1890_v55 = vadd.f32 %v422_v54, %v421_v50 }
  0xc6   : > { %v576_v56 = vpop.permute.xlu1 %575 }
  0xc7   : > { %v527_v61 = vpop.permute.xlu0 %526  ;;  %v590_v9 = vmul.f32 %v576_v56, %v1779_v1  ;;  %v591_v10 = vmul.f32 %v576_v56, %v1782_v2  ;;  %v375_v56 = vmul.f32 0.00390625, %v1880_v41 }
  0xc8   : > { %v544_v62 = vmul.f32 %v527_v61, %v1785_v3  ;;  %v545_v63 = vmul.f32 %v527_v61, %v1790_v5  ;;  %v326_v61 = vld [vmem:[%s2400_s2] sm:$0xff] }
  0xca   : > { %v580_v58 = vpop.permute.xlu1 %579  ;;  %v552_v17 = vadd.f32 %v546_v4, %v544_v62  ;;  %v561_v18 = vadd.f32 %v547_v8, %v545_v63  ;;  %v327_v62 = vld [vmem:[%s2400_s2 + $0x8] sm:$0xff]  ;;  %v1687_v4 = vmov 1966171168  }
  0xcb   : > { %v592_v23 = vmul.f32 %v580_v58, %v1793_v6  ;;  %v593_v24 = vmul.f32 %v580_v58, %v1796_v7  ;;  %v376_v58 = vmul.f32 0.00390625, %v1887_v51  ;;  %v638_v8 = vunpack.c.l.s4 %v1687_v4 }
  0xcd   : > { %v598_v6 = vadd.f32 %v592_v23, %v590_v9  ;;  %v607_v34 = vadd.f32 %v593_v24, %v591_v10  ;;  %v395_v23 = vmul.f32 %v375_v56, %v326_v61  ;;  %v396_v24 = vmul.f32 %v376_v58, %v327_v62 }
  0xce   : > { %v639_v10 = vunpack.c.0.s8 %v638_v8 }
  0xcf   : > { %v537_v60 = vpop.permute.xlu1 %536 }
  0xd0   : > { %v548_v11 = vmul.f32 %v537_v60, %v1817_v15  ;;  %v549_v12 = vmul.f32 %v537_v60, %v1820_v16  ;;  %v571_v60 = vstv %s1912_s11  ;;  %s1695_s11 = smov 112  }
  0xd2   : > { %v553_v30 = vadd.f32 %v552_v17, %v548_v11  ;;  %v562_v3 = vadd.f32 %v561_v18, %v549_v12  ;;  %v621_v11 = vstv %s1914_s13  ;;  %v617_v12 = vstv %s1916_s14  ;;  %s1532_s13 = sld [smem:[#allocation5 + $0x9]]  ;;  %s1534_s14 = sld [smem:[#allocation5 + $0x13]] }
  0xd4   : > { %v584_v0 = vpop.permute.xlu1 %583 }
  0xd5   : > { %v594_v15 = vmul.f32 %v584_v0, %v1811_v13  ;;  %v595_v16 = vmul.f32 %v584_v0, %v1814_v14 }
  0xd7   : > { %v599_v37 = vadd.f32 %v598_v6, %v594_v15  ;;  %v608_v38 = vadd.f32 %v607_v34, %v595_v16  ;;  %v631_v15 = vstv %s1920_s17  ;;  %v400_v34 = vsel %vm399_vm0, %v395_v23, 0.0  ;;  %s2045_s17 = sld [smem:[#allocation5 + $0x18]] }
  0xd9   : > { %v542_v27 = vpop.permute.xlu1 %541 }
  0xda   : > { %v550_v5 = vmul.f32 %v542_v27, %v1833_v21  ;;  %v551_v31 = vmul.f32 %v542_v27, %v1836_v22  ;;  %v377_v27 = vmul.f32 0.00390625, %v1892_v57  ;;  %v378_v57 = vmul.f32 0.00390625, %v1894_v59 }
  0xdc   : > { %v554_v32 = vadd.f32 %v553_v30, %v550_v5  ;;  %v563_v33 = vadd.f32 %v562_v3, %v551_v31  ;;  %v625_v30 = vstv %s1918_s16  ;;  %v328_v3 = vld [vmem:[%s2400_s2 + $0x10] sm:$0xff]  ;;  %v432_v5 = vlaneseq  ;;  %s2043_s16 = sld [smem:[#allocation5 + $0xe]] }
  0xde   : > { %v555_v7 = vrot.slane %v554_v32, 4  ;;  %v564_v35 = vrot.slane %v563_v33, 4  ;;  %v588_v36 = vpop.permute.xlu1 %587  ;;  %vm1952_vm1 = vcmp.lt.s32.totalorder %v432_v5, 256 }
  0xdf   : > { %v596_v21 = vmul.f32 %v588_v36, %v1827_v19  ;;  %v597_v22 = vmul.f32 %v588_v36, %v1830_v20  ;;  %v329_v36 = vld [vmem:[%s2400_s2 + $0x18] sm:$0xff] }
  0xe0   : > { %v556_v1 = vadd.f32 %v555_v7, %v554_v32  ;;  %v565_v39 = vadd.f32 %v564_v35, %v563_v33  ;;  %v401_v7 = vsel %vm399_vm0, %v396_v24, 0.0  ;;  %v397_v35 = vmul.f32 %v377_v27, %v328_v3  ;;  %v338_v27 = vld [vmem:[%s2400_s2 + $0x60] sm:$0xff] }
  0xe1   : > { %v600_v2 = vadd.f32 %v599_v37, %v596_v21  ;;  %v609_v40 = vadd.f32 %v608_v38, %v597_v22  ;;  %v433_v37 = vshrl.u32 %v432_v5, 7  ;;  %v402_v22 = vadd.f32 %v401_v7, %v400_v34  ;;  %v339_v34 = vld [vmem:[%s2400_s2 + $0x68] sm:$0xff] }
  0xe2   : > { %v557_v13 = vrot.slane %v556_v1, 2  ;;  %v566_v14 = vrot.slane %v565_v39, 2 }
  0xe3   : > { %v601_v42 = vrot.slane %v600_v2, 4  ;;  %v610_v43 = vrot.slane %v609_v40, 4 }
  0xe4   : > { %v558_v44 = vadd.f32 %v557_v13, %v556_v1  ;;  %v567_v45 = vadd.f32 %v566_v14, %v565_v39  ;;  %v1946_v1 = vsub.s32 %v639_v10, %v433_v37  ;;  %v398_v13 = vmul.f32 %v378_v57, %v329_v36  ;;  %v340_v10 = vld [vmem:[%s2400_s2 + $0x70] sm:$0xff]  ;;  %v341_v36 = vld [vmem:[%s2400_s2 + $0x78] sm:$0xff] }
  0xe5   : > { %v602_v19 = vadd.f32 %v601_v42, %v600_v2  ;;  %v611_v46 = vadd.f32 %v610_v43, %v609_v40  ;;  %v403_v40 = vsel %vm399_vm0, %v397_v35, 0.0 }
  0xe6   : > { %v559_v20 = vrot.slane %v558_v44, 1  ;;  %v568_v47 = vrot.slane %v567_v45, 1  ;;  %v404_v42 = vadd.f32 %v403_v40, %v402_v22  ;;  %v405_v43 = vsel %vm399_vm0, %v398_v13, 0.0 }
  0xe7   : > { %v603_v48 = vrot.slane %v602_v19, 2  ;;  %v612_v49 = vrot.slane %v611_v46, 2  ;;  %v1697_v22 = vmov 6   ;;  %v1700_v40 = vmov 0  }
  0xe8   : > { %v560_v50 = vadd.f32 %v559_v20, %v558_v44  ;;  %v569_v52 = vadd.f32 %v568_v47, %v567_v45  ;;  %v1960_v20 = vsub.s32 1, %v433_v37 }
  0xe9   : > { %v604_v53 = vadd.f32 %v603_v48, %v602_v19  ;;  %v613_v54 = vadd.f32 %v612_v49, %v611_v46  ;;  %v406_v19 = vadd.f32 %v405_v43, %v404_v42  ;;  %v424_v46 = vrot.slane %v1890_v55, 4 }
  0xea   : > { %v572_v41 = vadd.f32 %v571_v60, %v560_v50  ;;  %v573_v17 = vadd.f32 %v571_v60, %v569_v52  ;;  %v1962_v48 = vsub.s32 0, %v433_v37  ;;  %v2052_v42 = vand.u32 127, %v432_v5 }
  0xeb   : > { %v605_v63 = vrot.slane %v604_v53, 1  ;;  %v614_v0 = vrot.slane %v613_v54, 1  ;;  %v407_v47 = vrot.slane %v406_v19, 4  ;;  %v425_v50 = vadd.f32 %v424_v46, %v1890_v55 }
  0xec   : > { %v622_v16 = vmul.f32 %v621_v11, %v572_v41  ;;  %v623_v32 = vmul.f32 %v621_v11, %v573_v17  ;;  %v1690_v55 = vmov 4   ;;  %v342_v11 = vld [vmem:[%s2400_s2 + $0x80] sm:$0x1]  ;;  %v335_v17 = vld [vmem:[%s2400_s2 + $0x48] sm:$0xff]  ;;  %v667_v43 = vstv %s1534_s14  ;;  %s2128_s14 = sld [smem:[#allocation5 + $0xc]] }
  0xed   : > { %v606_v51 = vadd.f32 %v605_v63, %v604_v53  ;;  %v615_v18 = vadd.f32 %v614_v0, %v613_v54  ;;  %v408_v52 = vadd.f32 %v407_v47, %v406_v19  ;;  %v426_v56 = vrot.slane %v425_v50, 2  ;;  %1601 = vset.pattern.permute.xlu1 %v1690_v55  ;;  %1602 = vset.pattern.permute.xlu0 %v1690_v55 }
  0xee   : > { %vm689_vm2 = vcmp.lt.s32.totalorder %v2052_v42, 17  ;;  %v664_v47 = vstv %s2043_s16  ;;  %vm744_vm3 = vcmp.lt.s32.totalorder %v2052_v42, 16  ;;  %vm805_vm4 = vcmp.lt.s32.totalorder %v2052_v42, 15  ;;  %s2132_s16 = sld [smem:[#allocation5 + $0x16]] }
  0xef   : > { %v618_v31 = vadd.f32 %v617_v12, %v606_v51  ;;  %v619_v9 = vadd.f32 %v617_v12, %v615_v18  ;;  %v409_v58 = vrot.slane %v408_v52, 2  ;;  %v427_v60 = vadd.f32 %v426_v56, %v425_v50  ;;  %v336_v18 = vld [vmem:[%s2400_s2 + $0x50] sm:$0xff] }
  0xf0   : > { %v670_v50 = vstv %s2045_s17  ;;  %v718_v56 = vstv %s2049_s19  ;;  %vm864_vm5 = vcmp.lt.s32.totalorder %v2052_v42, 1  ;;  %s2141_s17 = sld [smem:[#allocation5 + $0xd]]  ;;  %vm923_vm6 = vcmp.lt.s32.totalorder %v2052_v42, 127 }
  0xf1   : > { %v626_v33 = vmul.f32 %v625_v30, %v618_v31  ;;  %v627_v6 = vmul.f32 %v625_v30, %v619_v9  ;;  %v410_v61 = vadd.f32 %v409_v58, %v408_v52  ;;  %v428_v62 = vrot.slane %v427_v60, 1  ;;  %v334_v30 = vld [vmem:[%s2400_s2 + $0x40] sm:$0xff] }
  0xf2   : > { %v695_v52 = vstv %s2047_s18  ;;  %s2147_s18 = sld [smem:[#allocation5 + $0x17]]  ;;  %vm982_vm7 = vcmp.lt.s32.totalorder %v2052_v42, 113  ;;  %vm1041_vm8 = vcmp.lt.s32.totalorder %v2052_v42, 112  ;;  %vm1100_vm9 = vcmp.lt.s32.totalorder %v2052_v42, 111 }
  0xf3   : > { %v628_v38 = vadd.f32 %v626_v33, %v622_v16  ;;  %v629_v21 = vadd.f32 %v627_v6, %v623_v32  ;;  %v411_v63 = vrot.slane %v410_v61, 1  ;;  %v429_v0 = vadd.f32 %v428_v62, %v427_v60 }
  0xf5   : > { %v632_v39 = vadd.f32 %v631_v15, %v628_v38  ;;  %v633_v2 = vadd.f32 %v631_v15, %v629_v21  ;;  %v412_v4 = vadd.f32 %v411_v63, %v410_v61  ;;  %v337_v15 = vld [vmem:[%s2400_s2 + $0x58] sm:$0xff]  ;;  %v756_v63 = vstv %s2054_s20 }
  0xf7   : > { %v636_v14 = vcombine.low %v632_v39, %v633_v2  ;;  %v430_v8 = vadd.f32 %v429_v0, %v412_v4  ;;  %v1698_v39 = vmov 5   ;;  %v1699_v2 = vmov 7  }
  0xf9   : > { %v643_v59 = vrot.slane %v636_v14, %v1946_v1  ;;  %v431_v12 = vadd.f32 %v430_v8, %v342_v11  ;;  %v779_v8 = vstv %s2056_s21 }
  0xfb   : > { %v650_v45 = vrot.slane %v643_v59, %v1946_v1  ;;  %v435_v41 = vrot.slane %v431_v12, %v1962_v48  ;;  %v661_v59 = vstv %s1532_s13  ;;  %s2103_s13 = sld [smem:[#allocation5 + $0x15]] }
  0xfd   : > { %656 = vst.msk [vmem:[#allocation2] sm:$0x3] %vm1952_vm1, %v650_v45  ;;  %v437_v51 = vmul.f32 %v435_v41, %v335_v17  ;;  %v438_v24 = vmul.f32 %v435_v41, %v336_v18  ;;  %v480_v31 = vmul.f32 %v435_v41, %v338_v27  ;;  %v436_v9 = vmul.f32 %v435_v41, %v334_v30 }
  0xfe   : > { %v482_v32 = vmul.f32 %v435_v41, %v340_v10  ;;  %v439_v6 = vmul.f32 %v435_v41, %v337_v15  ;;  %v481_v57 = vmul.f32 %v435_v41, %v339_v34  ;;  %v483_v38 = vmul.f32 %v435_v41, %v341_v36 }
  0xff   : > { %v443_v23 = vsel %vm399_vm0, %v437_v51, 0.0  ;;  %v446_v3 = vsel %vm399_vm0, %v438_v24, 0.0  ;;  %v484_v16 = vsel %vm399_vm0, %v480_v31, 0.0  ;;  %v440_v33 = vsel %vm399_vm0, %v436_v9, 0.0 }
 0x100   : > { %v490_v7 = vsel %vm399_vm0, %v482_v32, 0.0  ;;  %v449_v35 = vsel %vm399_vm0, %v439_v6, 0.0  ;;  %v487_v37 = vsel %vm399_vm0, %v481_v57, 0.0  ;;  %v493_v21 = vsel %vm399_vm0, %v483_v38, 0.0 }
 0x101   : > { %v838_v9 = vstv %s2061_s23  ;;  %v897_v32 = vstv %s2067_s26 }
 0x104   : > { %v1964_v49 = vld [vmem:[#allocation2] sm:$0x3] }
 0x105   : > { %v1969_v53 = vrot.slane %v1964_v49, %v1960_v20  ;;  %v1973_v54 = vrot.slane %v1964_v49, %v1962_v48  ;;  %v662_v19 = vmul.f32 %v661_v59, %v1964_v49  ;;  %v668_v5 = vmul.f32 %v667_v43, %v1964_v49  ;;  %v2080_v49 = vld [vmem:[%s2402_s4 + $0x8] sm:$0xff] }
 0x106   : > { %v750_v62 = vrot.slane %v2080_v49, 1  ;;  %v809_v18 = vrot.slane %v2080_v49, 2  ;;  %v868_v15 = vrot.slane %v2080_v49, 3  ;;  %v927_v57 = vrot.slane %v2080_v49, 4 }
 0x107   : > { %685 = vrot.lane.b32.xlu1 %v1969_v53, %s1688_s27  ;;  %683 = vrot.lane.b32.xlu0 %v1973_v54, %s1688_s27  ;;  %v2092_v0 = vadd.f32 %v664_v47, %v662_v19  ;;  %v2094_v4 = vadd.f32 %v670_v50, %v668_v5 }
 0x10b   : > { %740 = vrot.lane.b32.xlu1 %v1973_v54, %s1689_s28  ;;  %742 = vrot.lane.b32.xlu0 %v1969_v53, %s1689_s28  ;;  %s2323_s28 = scalar_lea.vmem %s2404_s6, %s1764_s9 }
 0x10f   : > { %801 = vrot.lane.b32.xlu1 %v1973_v54, %s1691_s29 }
 0x12a   : > { %444 = vadd.xlane.f32.xlu0 %v443_v23 }
 0x12e   : > { %447 = vadd.xlane.f32.xlu0 %v446_v3  ;;  %v815_v3 = vstv %s2058_s22 }
 0x132   : > { %485 = vadd.xlane.f32.xlu0 %v484_v16  ;;  %v874_v16 = vstv %s2065_s25 }
 0x133   : > { %441 = vadd.xlane.f32.xlu1 %v440_v33 }
 0x136   : > { %491 = vadd.xlane.f32.xlu0 %v490_v7 }
 0x137   : > { %450 = vadd.xlane.f32.xlu1 %v449_v35 }
 0x13b   : > { %488 = vadd.xlane.f32.xlu1 %v487_v37 }
 0x13f   : > { %494 = vadd.xlane.f32.xlu1 %v493_v21 }
 0x14c   : > { %803 = vrot.lane.b32.xlu0 %v1969_v53, %s1691_s29  ;;  %s1696_s29 = smov 111  }
 0x150   : > { %860 = vrot.lane.b32.xlu1 %v1973_v54, %s1692_s30  ;;  %862 = vrot.lane.b32.xlu0 %v1969_v53, %s1692_s30 }
 0x154   : > { %919 = vrot.lane.b32.xlu1 %v1973_v54, %s1693_s8  ;;  %921 = vrot.lane.b32.xlu0 %v1969_v53, %s1693_s8 }
 0x158   : > { %978 = vrot.lane.b32.xlu1 %v1973_v54, %s1694_s10  ;;  %980 = vrot.lane.b32.xlu0 %v1969_v53, %s1694_s10  ;;  %s2084_s10 = sld [smem:[#allocation5 + $0xa]] }
 0x15c   : > { %1037 = vrot.lane.b32.xlu1 %v1973_v54, %s1695_s11  ;;  %1039 = vrot.lane.b32.xlu0 %v1969_v53, %s1695_s11  ;;  %s2090_s11 = sld [smem:[#allocation5 + $0x14]] }
 0x160   : > { %1096 = vrot.lane.b32.xlu1 %v1973_v54, %s1696_s29  ;;  %1098 = vrot.lane.b32.xlu0 %v1969_v53, %s1696_s29  ;;  %v2075_v54 = vld [vmem:[%s2402_s4] sm:$0xff]  ;;  %s2097_s29 = sld [smem:[#allocation5 + $0xb]] }
 0x161   : > { %v749_v61 = vrot.slane %v2075_v54, 1  ;;  %v808_v51 = vrot.slane %v2075_v54, 2  ;;  %v867_v10 = vrot.slane %v2075_v54, 3  ;;  %v926_v33 = vrot.slane %v2075_v54, 4 }
 0x162   : > { %v985_v43 = vrot.slane %v2075_v54, 5 }
 0x164   : > { %1239 = vperm.xlu1 %1601, %v1851_v26   ;;  %1243 = vperm.xlu0 %1602, %v1845_v25  }
 0x166   : > { %v992_v19 = vstv %s2097_s29 }
 0x168   : > { %1247 = vperm.xlu1 %1601, %v1859_v28   ;;  %1603 = vset.pattern.permute.xlu0 %v1697_v22 }
 0x169   : > { %1346 = vperm.xlu0 %1603, %v1851_v26  }
 0x16c   : > { %1251 = vperm.xlu1 %1601, %v1866_v29  }
 0x16d   : > { %1358 = vperm.xlu0 %1603, %v1866_v29  }
 0x170   : > { %1604 = vset.pattern.permute.xlu1 %v1697_v22  ;;  %v933_v22 = vstv %s2084_s10  ;;  %s2347_s10 = scalar_lea.vmem %s2405_s7, %s1764_s9 }
 0x171   : > { %1350 = vperm.xlu1 %1604, %v1845_v25   ;;  %1606 = vset.pattern.permute.xlu0 %v1698_v39 }
 0x172   : > { %1267 = vperm.xlu0 %1606, %v1845_v25  }
 0x175   : > { %1354 = vperm.xlu1 %1604, %v1859_v28  }
 0x176   : > { %1607 = vset.pattern.permute.xlu0 %v1699_v2 }
 0x177   : > { %1370 = vperm.xlu0 %1607, %v1851_v26  }
 0x179   : > { %1605 = vset.pattern.permute.xlu1 %v1698_v39  ;;  %v684_v13 = vpop.permute.xlu0 %683  ;;  %v686_v14 = vpop.permute.xlu1 %685 }
 0x17a   : > { %1263 = vperm.xlu1 %1605, %v1851_v26   ;;  %v690_v58 = vsel %vm689_vm2, %v684_v13, %v686_v14  ;;  %v691_v55 = vsel %vm689_vm2, %v686_v14, %v684_v13  ;;  %v956_v14 = vstv %s2090_s11 }
 0x17b   : > { %1609 = vset.pattern.permute.xlu0 %v1700_v40  ;;  %v692_v12 = vmul.f32 %v691_v55, %v2075_v54  ;;  %v693_v41 = vmul.f32 %v690_v58, %v2080_v49 }
 0x17d   : > { %v743_v45 = vpop.permute.xlu0 %742  ;;  %v741_v46 = vpop.permute.xlu1 %740  ;;  %v696_v6 = vmul.f32 %v695_v52, %v692_v12  ;;  %v697_v34 = vmul.f32 %v695_v52, %v693_v41  ;;  %v719_v39 = vmul.f32 %v718_v56, %v692_v12  ;;  %v1015_v52 = vstv %s2103_s13 }
 0x17e   : > { %1271 = vperm.xlu1 %1605, %v1859_v28   ;;  %v746_v23 = vsel %vm744_vm3, %v743_v45, %v741_v46  ;;  %v745_v31 = vsel %vm744_vm3, %v741_v46, %v743_v45  ;;  %v986_v45 = vrot.slane %v2080_v49, 5 }
 0x17f   : > { %v753_v7 = vmul.f32 %v749_v61, %v746_v23  ;;  %v754_v36 = vmul.f32 %v750_v62, %v745_v31  ;;  %v700_v5 = vcombine.low %v696_v6, %v697_v34 }
 0x181   : > { %v802_v24 = vpop.permute.xlu1 %801  ;;  %v757_v46 = vmul.f32 %v756_v63, %v753_v7  ;;  %v780_v12 = vmul.f32 %v779_v8, %v753_v7 }
 0x182   : > { %1275 = vperm.xlu1 %1605, %v1866_v29  }
 0x186   : > { %1608 = vset.pattern.permute.xlu1 %v1700_v40  ;;  %v720_v40 = vmul.f32 %v718_v56, %v693_v41  ;;  %v781_v41 = vmul.f32 %v779_v8, %v754_v36 }
 0x1b7   : > { %v445_v53 = vpop.xlane.xlu0 %444 }
 0x1b8   : > { %v453_v60 = vadd.f32 %v445_v53, %v1845_v25  ;;  %v758_v53 = vmul.f32 %v756_v63, %v754_v36  ;;  %v707_v63 = vrot.slane %v700_v5, %v1946_v1 }
 0x1ba   : > { %v457_v11 = vsub.f32 0.0, %v453_v60  ;;  %v761_v31 = vcombine.low %v757_v46, %v758_v53  ;;  %v1074_v53 = vstv %s2132_s16 }
 0x1bb   : > { %v448_v17 = vpop.xlane.xlu0 %447 }
 0x1bc   : > { %v462_v27 = vmul.f32 1.442695, %v457_v11  ;;  %v454_v30 = vadd.f32 %v448_v17, %v1859_v28  ;;  %v1044_v11 = vrot.slane %v2075_v54, 6 }
 0x1be   : > { %1614 = vpow2.f32 %v462_v27  ;;  %v458_v37 = vsub.f32 0.0, %v454_v30  ;;  %v1045_v27 = vrot.slane %v2080_v49, 6 }
 0x1bf   : > { %v486_v35 = vpop.xlane.xlu0 %485 }
 0x1c0   : > { %v496_v38 = vadd.f32 %v486_v35, %v1851_v26  ;;  %v442_v21 = vpop.xlane.xlu1 %441  ;;  %v464_v58 = vmul.f32 1.442695, %v458_v37 }
 0x1c1   : > { %v452_v13 = vadd.f32 %v442_v21, %v1851_v26  ;;  %v723_v26 = vcombine.low %v719_v39, %v720_v40  ;;  %v784_v21 = vcombine.low %v780_v12, %v781_v41 }
 0x1c2   : > { %v500_v59 = vsub.f32 0.0, %v496_v38 }
 0x1c3   : > { %v456_v47 = vsub.f32 0.0, %v452_v13  ;;  %v492_v50 = vpop.xlane.xlu0 %491  ;;  %v730_v38 = vrot.slane %v723_v26, %v1946_v1 }
 0x1c4   : > { %v504_v55 = vmul.f32 1.442695, %v500_v59  ;;  %v498_v60 = vadd.f32 %v492_v50, %v1859_v28  ;;  %v451_v56 = vpop.xlane.xlu1 %450 }
 0x1c5   : > { %v460_v61 = vmul.f32 1.442695, %v456_v47  ;;  %v455_v62 = vadd.f32 %v451_v56, %v1866_v29 }
 0x1c6   : > { %1616 = vpow2.f32 %v504_v55  ;;  %v502_v17 = vsub.f32 0.0, %v498_v60  ;;  %v1103_v60 = vrot.slane %v2075_v54, 7 }
 0x1c7   : > { %1618 = vpow2.f32 %v460_v61  ;;  %v459_v28 = vsub.f32 0.0, %v455_v62  ;;  %v804_v23 = vpop.permute.xlu0 %803  ;;  %v791_v62 = vrot.slane %v784_v21, %v1946_v1 }
 0x1c8   : > { %v1615_v30 = vpop.eup %1614  ;;  %1620 = vpow2.f32 %v464_v58  ;;  %v806_v6 = vsel %vm805_vm4, %v802_v24, %v804_v23  ;;  %v807_v8 = vsel %vm805_vm4, %v804_v23, %v802_v24  ;;  %v489_v34 = vpop.xlane.xlu1 %488  ;;  %v508_v24 = vmul.f32 1.442695, %v502_v17 }
 0x1c9   : > { %v469_v7 = vadd.f32 1.0, %v1615_v30  ;;  %v466_v35 = vmul.f32 1.442695, %v459_v28  ;;  %v812_v36 = vmul.f32 %v808_v51, %v807_v8  ;;  %v813_v37 = vmul.f32 %v809_v18, %v806_v6 }
 0x1ca   : > { %v497_v39 = vadd.f32 %v489_v34, %v1845_v25  ;;  %v768_v18 = vrot.slane %v761_v31, %v1946_v1  ;;  %v1051_v25 = vstv %s2128_s14  ;;  %v714_v58 = vrot.slane %v707_v63, %v1946_v1 }
 0x1cb   : > { %1622 = vrcp.f32 %v469_v7  ;;  %v816_v40 = vmul.f32 %v815_v3, %v812_v36  ;;  %v817_v13 = vmul.f32 %v815_v3, %v813_v37  ;;  %v839_v51 = vmul.f32 %v838_v9, %v812_v36  ;;  %v863_v59 = vpop.permute.xlu0 %862 }
 0x1cc   : > { %1624 = vpow2.f32 %v466_v35  ;;  %v840_v5 = vmul.f32 %v838_v9, %v813_v37  ;;  %v501_v46 = vsub.f32 0.0, %v497_v39  ;;  %v495_v47 = vpop.xlane.xlu1 %494  ;;  %v737_v3 = vrot.slane %v730_v38, %v1946_v1 }
 0x1cd   : > { %v499_v50 = vadd.f32 %v495_v47, %v1866_v29  ;;  %1626 = vpow2.f32 %v508_v24  ;;  %v820_v56 = vcombine.low %v816_v40, %v817_v13  ;;  %v775_v29 = vrot.slane %v768_v18, %v1946_v1 }
 0x1ce   : > { %v506_v55 = vmul.f32 1.442695, %v501_v46  ;;  %v843_v9 = vcombine.low %v839_v51, %v840_v5  ;;  %v1104_v17 = vrot.slane %v2080_v49, 7  ;;  %v1110_v30 = vstv %s2141_s17 }
 0x1cf   : > { %v503_v26 = vsub.f32 0.0, %v499_v50  ;;  %v922_v12 = vpop.permute.xlu0 %921  ;;  %v1133_v31 = vstv %s2147_s18  ;;  %v716_v8 = vadd.f32 %v714_v58, %v2092_v0  ;;  %v739_v34 = vadd.f32 %v737_v3, %v2094_v4 }
 0x1d0   : > { %v1617_v61 = vpop.eup %1616  ;;  %1628 = vpow2.f32 %v506_v55  ;;  %v861_v41 = vpop.permute.xlu1 %860  ;;  %v827_v37 = vrot.slane %v820_v56, %v1946_v1  ;;  %v850_v38 = vrot.slane %v843_v9, %v1946_v1  ;;  %v798_v4 = vrot.slane %v791_v62, %v1946_v1 }
 0x1d1   : > { %v1619_v63 = vpop.eup %1618  ;;  %v510_v28 = vmul.f32 1.442695, %v503_v26  ;;  %v865_v23 = vsel %vm864_vm5, %v861_v41, %v863_v59  ;;  %v866_v7 = vsel %vm864_vm5, %v863_v59, %v861_v41  ;;  %v512_v36 = vadd.f32 1.0, %v1617_v61 }
 0x1d2   : > { %v1621_v6 = vpop.eup %1620  ;;  %v872_v35 = vmul.f32 %v868_v15, %v865_v23  ;;  %v871_v0 = vmul.f32 %v867_v10, %v866_v7  ;;  %v777_v21 = vadd.f32 %v775_v29, %v716_v8  ;;  %v468_v24 = vadd.f32 1.0, %v1619_v63 }
 0x1d3   : > { %1630 = vpow2.f32 %v510_v28  ;;  %v470_v5 = vadd.f32 1.0, %v1621_v6  ;;  %v981_v46 = vpop.permute.xlu0 %980  ;;  %v834_v58 = vrot.slane %v827_v37, %v1946_v1  ;;  %v1701_v37 = vmov 1  }
 0x1d4   : > { %v876_v39 = vmul.f32 %v874_v16, %v872_v35  ;;  %v920_v40 = vpop.permute.xlu1 %919  ;;  %v875_v15 = vmul.f32 %v874_v16, %v871_v0  ;;  %v898_v51 = vmul.f32 %v897_v32, %v871_v0  ;;  %v899_v59 = vmul.f32 %v897_v32, %v872_v35 }
 0x1d5   : > { %v1623_v13 = vpop.eup %1622  ;;  %v924_v10 = vsel %vm923_vm6, %v920_v40, %v922_v12  ;;  %v925_v47 = vsel %vm923_vm6, %v922_v12, %v920_v40  ;;  %1632 = vrcp.f32 %v512_v36  ;;  %v857_v16 = vrot.slane %v850_v38, %v1946_v1 }
 0x1d6   : > { %v1625_v18 = vpop.eup %1624  ;;  %v1188_v50 = vadd.f32 1.0, %v1623_v13  ;;  %v879_v3 = vcombine.low %v875_v15, %v876_v39  ;;  %v800_v32 = vadd.f32 %v798_v4, %v739_v34  ;;  %1634 = vrcp.f32 %v468_v24 }
 0x1d7   : > { %v930_v55 = vmul.f32 %v926_v33, %v924_v10  ;;  %v931_v56 = vmul.f32 %v927_v57, %v925_v47  ;;  %v1627_v26 = vpop.eup %1626  ;;  %v471_v61 = vadd.f32 1.0, %v1625_v18  ;;  %v902_v62 = vcombine.low %v898_v51, %v899_v59  ;;  %v1040_v35 = vpop.permute.xlu0 %1039 }
 0x1d8   : > { %v979_v9 = vpop.permute.xlu1 %978  ;;  %1198 = vperm.xlu0 %1609, %v1188_v50   ;;  %v886_v29 = vrot.slane %v879_v3, %v1946_v1  ;;  %1636 = vrcp.f32 %v470_v5  ;;  %v836_v23 = vadd.f32 %v834_v58, %v777_v21  ;;  %v859_v6 = vadd.f32 %v857_v16, %v800_v32 }
 0x1d9   : > { %v983_v12 = vsel %vm982_vm7, %v979_v9, %v981_v46  ;;  %v934_v63 = vmul.f32 %v933_v22, %v930_v55  ;;  %v935_v33 = vmul.f32 %v933_v22, %v931_v56  ;;  %v957_v28 = vmul.f32 %v956_v14, %v930_v55 }
 0x1da   : > { %v1629_v41 = vpop.eup %1628  ;;  %v958_v57 = vmul.f32 %v956_v14, %v931_v56  ;;  %v984_v8 = vsel %vm982_vm7, %v981_v46, %v979_v9  ;;  %v989_v22 = vmul.f32 %v985_v43, %v983_v12  ;;  %v514_v38 = vadd.f32 1.0, %v1627_v26 }
 0x1db   : > { %v513_v34 = vadd.f32 1.0, %v1629_v41  ;;  %v938_v7 = vcombine.low %v934_v63, %v935_v33  ;;  %v990_v36 = vmul.f32 %v986_v45, %v984_v8  ;;  %1638 = vrcp.f32 %v471_v61  ;;  %v1099_v32 = vpop.permute.xlu0 %1098 }
 0x1dc   : > { %v1038_v14 = vpop.permute.xlu1 %1037  ;;  %1610 = vset.pattern.permute.xlu0 %v1701_v37  ;;  %v909_v0 = vrot.slane %v902_v62, %v1946_v1  ;;  %v893_v4 = vrot.slane %v886_v29, %v1946_v1  ;;  %v961_v24 = vcombine.low %v957_v28, %v958_v57  ;;  %v993_v43 = vmul.f32 %v992_v19, %v989_v22 }
 0x1dd   : > { %v1042_v21 = vsel %vm1041_vm8, %v1038_v14, %v1040_v35  ;;  %v994_v45 = vmul.f32 %v992_v19, %v990_v36  ;;  %v1631_v39 = vpop.eup %1630  ;;  %v1016_v40 = vmul.f32 %v1015_v52, %v989_v22  ;;  %v1017_v13 = vmul.f32 %v1015_v52, %v990_v36 }
 0x1de   : > { %v1043_v15 = vsel %vm1041_vm8, %v1040_v35, %v1038_v14  ;;  %v1048_v51 = vmul.f32 %v1044_v11, %v1042_v21  ;;  %1640 = vrcp.f32 %v513_v34  ;;  %v515_v59 = vadd.f32 1.0, %v1631_v39 }
 0x1df   : > { %v945_v18 = vrot.slane %v938_v7, %v1946_v1  ;;  %v997_v5 = vcombine.low %v993_v43, %v994_v45  ;;  %v1633_v19 = vpop.eup %1632  ;;  %v1020_v10 = vcombine.low %v1016_v40, %v1017_v13  ;;  %v1049_v47 = vmul.f32 %v1045_v27, %v1043_v15 }
 0x1e0   : > { %v1097_v46 = vpop.permute.xlu1 %1096  ;;  %v1052_v52 = vmul.f32 %v1051_v25, %v1048_v51  ;;  %v1075_v50 = vmul.f32 %v1074_v53, %v1048_v51  ;;  %v1635_v58 = vpop.eup %1634  ;;  %1642 = vrcp.f32 %v515_v59  ;;  %v895_v11 = vadd.f32 %v893_v4, %v836_v23 }
 0x1e1   : > { %v916_v16 = vrot.slane %v909_v0, %v1946_v1  ;;  %v968_v3 = vrot.slane %v961_v24, %v1946_v1  ;;  %v1004_v55 = vrot.slane %v997_v5, %v1946_v1  ;;  %v1053_v56 = vmul.f32 %v1051_v25, %v1049_v47 }
 0x1e2   : > { %v1076_v27 = vmul.f32 %v1074_v53, %v1049_v47  ;;  %v1101_v9 = vsel %vm1100_vm9, %v1097_v46, %v1099_v32  ;;  %v1027_v26 = vrot.slane %v1020_v10, %v1946_v1  ;;  %v1102_v61 = vsel %vm1100_vm9, %v1099_v32, %v1097_v46  ;;  %v1637_v12 = vpop.eup %1636  ;;  %v1656_v32 = vld [vmem:[%s2401_s3 + $0x10] sm:$0xff] }
 0x1e3   : > { %v1107_v29 = vmul.f32 %v1103_v60, %v1101_v9  ;;  %v1294_v62 = vadd.f32 1.0, %v1633_v19  ;;  %v952_v41 = vrot.slane %v945_v18, %v1946_v1  ;;  %v1056_v25 = vcombine.low %v1052_v52, %v1053_v56 }
 0x1e4   : > { %v1079_v63 = vcombine.low %v1075_v50, %v1076_v27  ;;  %v1108_v53 = vmul.f32 %v1104_v17, %v1102_v61  ;;  %v975_v33 = vrot.slane %v968_v3, %v1946_v1  ;;  %v1187_v54 = vadd.f32 1.0, %v1635_v58  ;;  %v1654_v50 = vld [vmem:[%s2401_s3 + $0x18] sm:$0xff]  ;;  %v1655_v58 = vld [vmem:[%s2401_s3 + $0x8] sm:$0xff]  ;;  %v1240_v27 = vpop.permute.xlu1 %1239 }
 0x1e5   : > { %v1111_v28 = vmul.f32 %v1110_v30, %v1107_v29  ;;  %v1134_v42 = vmul.f32 %v1133_v31, %v1107_v29  ;;  %1300 = vperm.xlu0 %1610, %v1294_v62   ;;  %v1639_v60 = vpop.eup %1638  ;;  %v1011_v57 = vrot.slane %v1004_v55, %v1946_v1  ;;  %v1063_v23 = vrot.slane %v1056_v25, %v1946_v1 }
 0x1e6   : > { %v1086_v8 = vrot.slane %v1079_v63, %v1946_v1  ;;  %v1112_v34 = vmul.f32 %v1110_v30, %v1108_v53  ;;  %v918_v7 = vadd.f32 %v916_v16, %v859_v6  ;;  %v1034_v49 = vrot.slane %v1027_v26, %v1946_v1  ;;  %1193 = vperm.xlu1 %1608, %v1187_v54  }
 0x1e7   : > { %v1135_v17 = vmul.f32 %v1133_v31, %v1108_v53  ;;  %1644 = vrcp.f32 %v514_v38  ;;  %v954_v35 = vadd.f32 %v952_v41, %v895_v11  ;;  %v1070_v22 = vrot.slane %v1063_v23, %v1946_v1 }
 0x1e8   : > { %v1115_v36 = vcombine.low %v1111_v28, %v1112_v34  ;;  %v1641_v14 = vpop.eup %1640  ;;  %v977_v0 = vadd.f32 %v975_v33, %v918_v7  ;;  %v1093_v21 = vrot.slane %v1086_v8, %v1946_v1  ;;  %v1189_v24 = vadd.f32 1.0, %v1637_v12  ;;  %v2299_v26 = vpop.permute.xlu1 %1247  ;;  %v1171_v28 = vld [vmem:[%s1776_s15 + $0x10] sm:$0xff] }
 0x1e9   : > { %v1138_v4 = vcombine.low %v1134_v42, %v1135_v17  ;;  %v1013_v43 = vadd.f32 %v1011_v57, %v954_v35  ;;  %v1190_v51 = vadd.f32 1.0, %v1639_v60  ;;  %v1295_v47 = vadd.f32 1.0, %v1641_v14  ;;  %v1172_v42 = vld [vmem:[%s1776_s15 + $0x18] sm:$0xff] }
 0x1ea   : > { %v1122_v30 = vrot.slane %v1115_v36, %v1946_v1  ;;  %v1643_v6 = vpop.eup %1642  ;;  %v1036_v45 = vadd.f32 %v1034_v49, %v977_v0  ;;  %1203 = vperm.xlu1 %1608, %v1189_v24  }
 0x1eb   : > { %v1145_v39 = vrot.slane %v1138_v4, %v1946_v1  ;;  %v1072_v31 = vadd.f32 %v1070_v22, %v1013_v43  ;;  %v1297_v40 = vadd.f32 1.0, %v1643_v6  ;;  %v1178_v4 = vld [vmem:[%s1770_s12 + $0x8] sm:$0xff]  ;;  %v1169_v6 = vld [vmem:[%s1776_s15] sm:$0xff] }
 0x1ec   : > { %v1129_v38 = vrot.slane %v1122_v30, %v1946_v1  ;;  %v1095_v13 = vadd.f32 %v1093_v21, %v1036_v45  ;;  %v2303_v29 = vpop.permute.xlu1 %1251  ;;  %v1177_v21 = vld [vmem:[%s1770_s12] sm:$0xff]  ;;  %v1170_v45 = vld [vmem:[%s1776_s15 + $0x8] sm:$0xff] }
 0x1ed   : > { %v1152_v15 = vrot.slane %v1145_v39, %v1946_v1  ;;  %1315 = vperm.xlu0 %1610, %v1297_v40  }
 0x1ee   : > { %v1131_v59 = vadd.f32 %v1129_v38, %v1072_v31  ;;  %1208 = vperm.xlu1 %1608, %v1190_v51  }
 0x1ef   : > { %v1154_v18 = vadd.f32 %v1152_v15, %v1095_v13 }
 0x1f0   : > { %v1155_v5 = vsub.f32 0.0, %v1131_v59  ;;  %v2305_v62 = vpop.permute.xlu1 %1350 }
 0x1f1   : > { %v1162_v46 = vsub.f32 0.0, %v1154_v18  ;;  %v1645_v19 = vpop.eup %1644  ;;  %1613 = vset.pattern.permute.xlu0 %v1699_v2 }
 0x1f2   : > { %v1156_v10 = vmul.f32 1.442695, %v1155_v5  ;;  %1611 = vset.pattern.permute.xlu1 %v1701_v37  ;;  %1382 = vperm.xlu0 %1613, %v1654_v50   ;;  %v1296_v1 = vadd.f32 1.0, %v1645_v19 }
 0x1f3   : > { %v1163_v52 = vmul.f32 1.442695, %v1162_v46  ;;  %1305 = vperm.xlu1 %1611, %v1295_v47   ;;  %v1174_v47 = vld [vmem:[%s1776_s15 + $0x28] sm:$0xff] }
 0x1f4   : > { %1646 = vpow2.f32 %v1156_v10  ;;  %v2307_v41 = vpop.permute.xlu1 %1354  ;;  %v1173_v10 = vld [vmem:[%s1776_s15 + $0x20] sm:$0xff] }
 0x1f5   : > { %1648 = vpow2.f32 %v1163_v52 }
 0x1f7   : > { %1310 = vperm.xlu1 %1611, %v1296_v1  }
 0x1f9   : > { %v1264_v33 = vpop.permute.xlu1 %1263 }
 0x1fb   : > { %1612 = vset.pattern.permute.xlu1 %v1699_v2  ;;  %v1244_v2 = vpop.permute.xlu0 %1243 }
 0x1fc   : > { %1374 = vperm.xlu1 %1612, %v1655_v58  }
 0x1fd   : > { %v1272_v49 = vpop.permute.xlu1 %1271 }
 0x1fe   : > { %v1647_v11 = vpop.eup %1646 }
 0x1ff   : > { %v1649_v16 = vpop.eup %1648  ;;  %v1158_v37 = vadd.f32 1.0, %v1647_v11  ;;  %v1347_v9 = vpop.permute.xlu0 %1346  ;;  %v1183_v11 = vld [vmem:[%s1770_s12 + $0x30] sm:$0xff] }
 0x200   : > { %v1165_v3 = vadd.f32 1.0, %v1649_v16  ;;  %1378 = vperm.xlu1 %1612, %v1656_v32   ;;  %v1184_v16 = vld [vmem:[%s1770_s12 + $0x38] sm:$0xff] }
 0x201   : > { %1650 = vrcp.f32 %v1158_v37  ;;  %v2327_v36 = vpop.permute.xlu1 %1275 }
 0x202   : > { %1652 = vrcp.f32 %v1165_v3 }
 0x203   : > { %v2301_v61 = vpop.permute.xlu0 %1358 }
 0x207   : > { %v1268_v12 = vpop.permute.xlu0 %1267 }
 0x20b   : > { %v1651_v55 = vpop.eup %1650  ;;  %v1371_v25 = vpop.permute.xlu0 %1370 }
 0x20c   : > { %v1653_v56 = vpop.eup %1652  ;;  %1161 = vst.msk [vmem:[#allocation3] sm:$0x3] %vm1952_vm1, %v1651_v55  ;;  %v1175_v55 = vld [vmem:[%s1776_s15 + $0x30] sm:$0xff] }
 0x20d   : > { %1168 = vst.msk [vmem:[#allocation4] sm:$0x3] %vm1952_vm1, %v1653_v56  ;;  %v1176_v56 = vld [vmem:[%s1776_s15 + $0x38] sm:$0xff] }
 0x213   : > { %v1185_v44 = vld [vmem:[#allocation3] sm:$0x3] }
 0x214   : > { %v2310_v63 = vrot.slane %v1185_v44, %v1962_v48  ;;  %v2313_v53 = vrot.slane %v1185_v44, %v1960_v20  ;;  %v1186_v22 = vld [vmem:[#allocation4] sm:$0x3] }
 0x215   : > { %v2330_v14 = vrot.slane %v1186_v22, %v1962_v48  ;;  %v2333_v0 = vrot.slane %v1186_v22, %v1960_v20 }
 0x257   : > { %v1199_v54 = vpop.permute.xlu0 %1198 }
 0x258   : > { %v1224_v60 = vadd.f32 %v2310_v63, %v1199_v54  ;;  %v1225_v57 = vadd.f32 %v2313_v53, %v1199_v54 }
 0x25a   : > { %v1232_v23 = vmul.f32 %v1224_v60, %v1171_v28  ;;  %v1233_v8 = vmul.f32 %v1225_v57, %v1172_v42 }
 0x25c   : > { %v1256_v34 = vmul.f32 %v1244_v2, %v1232_v23  ;;  %v1257_v7 = vmul.f32 %v1244_v2, %v1233_v8 }
 0x25e   : > { %v1280_v17 = vadd.f32 %v1268_v12, %v1256_v34  ;;  %v1281_v35 = vadd.f32 %v1268_v12, %v1257_v7 }
 0x260   : > { %1288 = vst [vmem:[%s2323_s28 + $0x10] sm:$0xff] %v1280_v17  ;;  %1289 = vst [vmem:[%s2323_s28 + $0x18] sm:$0xff] %v1281_v35  ;;  %v1179_v17 = vld [vmem:[%s1770_s12 + $0x10] sm:$0xff] }
 0x264   : > { %v1301_v24 = vpop.permute.xlu0 %1300 }
 0x265   : > { %v1329_v43 = vadd.f32 %v2330_v14, %v1301_v24  ;;  %v1330_v30 = vadd.f32 %v2333_v0, %v1301_v24  ;;  %v1194_v39 = vpop.permute.xlu1 %1193 }
 0x266   : > { %v1222_v48 = vadd.f32 %v2310_v63, %v1194_v39  ;;  %v1223_v20 = vadd.f32 %v2313_v53, %v1194_v39 }
 0x267   : > { %v1337_v31 = vmul.f32 %v1329_v43, %v1177_v21  ;;  %v1338_v38 = vmul.f32 %v1330_v30, %v1178_v4 }
 0x268   : > { %v1230_v15 = vmul.f32 %v1222_v48, %v1169_v6  ;;  %v1231_v51 = vmul.f32 %v1223_v20, %v1170_v45  ;;  %v1181_v6 = vld [vmem:[%s1770_s12 + $0x20] sm:$0xff]  ;;  %v1182_v45 = vld [vmem:[%s1770_s12 + $0x28] sm:$0xff] }
 0x269   : > { %v1361_v40 = vmul.f32 %v1347_v9, %v1337_v31  ;;  %v1362_v13 = vmul.f32 %v1347_v9, %v1338_v38  ;;  %v1204_v59 = vpop.permute.xlu1 %1203 }
 0x26a   : > { %v1254_v46 = vmul.f32 %v1240_v27, %v1230_v15  ;;  %v1255_v19 = vmul.f32 %v1240_v27, %v1231_v51  ;;  %v1226_v52 = vadd.f32 %v2310_v63, %v1204_v59  ;;  %v1227_v50 = vadd.f32 %v2313_v53, %v1204_v59 }
 0x26b   : > { %v1385_v18 = vadd.f32 %v1371_v25, %v1361_v40  ;;  %v1386_v5 = vadd.f32 %v1371_v25, %v1362_v13 }
 0x26c   : > { %v1278_v1 = vadd.f32 %v1264_v33, %v1254_v46  ;;  %v1279_v58 = vadd.f32 %v1264_v33, %v1255_v19  ;;  %v1316_v37 = vpop.permute.xlu0 %1315  ;;  %v1234_v3 = vmul.f32 %v1226_v52, %v1173_v10  ;;  %v1235_v32 = vmul.f32 %v1227_v50, %v1174_v47 }
 0x26d   : > { %1393 = vst [vmem:[%s2347_s10] sm:$0xff] %v1385_v18  ;;  %1394 = vst [vmem:[%s2347_s10 + $0x8] sm:$0xff] %v1386_v5  ;;  %v1209_v2 = vpop.permute.xlu1 %1208  ;;  %v1335_v27 = vadd.f32 %v2330_v14, %v1316_v37  ;;  %v1336_v9 = vadd.f32 %v2333_v0, %v1316_v37 }
 0x26e   : > { %1286 = vst [vmem:[%s2323_s28] sm:$0xff] %v1278_v1  ;;  %1287 = vst [vmem:[%s2323_s28 + $0x8] sm:$0xff] %v1279_v58  ;;  %v1228_v12 = vadd.f32 %v2310_v63, %v1209_v2  ;;  %v1229_v25 = vadd.f32 %v2313_v53, %v1209_v2  ;;  %v1258_v44 = vmul.f32 %v2299_v26, %v1234_v3 }
 0x26f   : > { %v1259_v33 = vmul.f32 %v2299_v26, %v1235_v32  ;;  %v1343_v28 = vmul.f32 %v1335_v27, %v1183_v11  ;;  %v1344_v42 = vmul.f32 %v1336_v9, %v1184_v16 }
 0x270   : > { %v1236_v54 = vmul.f32 %v1228_v12, %v1175_v55  ;;  %v1237_v60 = vmul.f32 %v1229_v25, %v1176_v56  ;;  %v1282_v57 = vadd.f32 %v1272_v49, %v1258_v44 }
 0x271   : > { %v1283_v23 = vadd.f32 %v1272_v49, %v1259_v33  ;;  %v1383_v8 = vpop.permute.xlu0 %1382  ;;  %v1367_v63 = vmul.f32 %v2301_v61, %v1343_v28  ;;  %v1368_v53 = vmul.f32 %v2301_v61, %v1344_v42  ;;  %v1180_v49 = vld [vmem:[%s1770_s12 + $0x18] sm:$0xff] }
 0x272   : > { %v1260_v34 = vmul.f32 %v2303_v29, %v1236_v54  ;;  %v1261_v26 = vmul.f32 %v2303_v29, %v1237_v60  ;;  %v1306_v7 = vpop.permute.xlu1 %1305  ;;  %1290 = vst [vmem:[%s2323_s28 + $0x20] sm:$0xff] %v1282_v57 }
 0x273   : > { %1291 = vst [vmem:[%s2323_s28 + $0x28] sm:$0xff] %v1283_v23  ;;  %v1331_v35 = vadd.f32 %v2330_v14, %v1306_v7  ;;  %v1332_v22 = vadd.f32 %v2333_v0, %v1306_v7  ;;  %v1391_v21 = vadd.f32 %v1383_v8, %v1367_v63  ;;  %v1392_v4 = vadd.f32 %v1383_v8, %v1368_v53 }
 0x274   : > { %v1284_v61 = vadd.f32 %v2327_v36, %v1260_v34  ;;  %v1285_v24 = vadd.f32 %v2327_v36, %v1261_v26 }
 0x275   : > { %1399 = vst [vmem:[%s2347_s10 + $0x30] sm:$0xff] %v1391_v21  ;;  %1400 = vst [vmem:[%s2347_s10 + $0x38] sm:$0xff] %v1392_v4  ;;  %v1339_v29 = vmul.f32 %v1331_v35, %v1179_v17  ;;  %v1340_v43 = vmul.f32 %v1332_v22, %v1180_v49 }
 0x276   : > { %1292 = vst [vmem:[%s2323_s28 + $0x30] sm:$0xff] %v1284_v61  ;;  %1293 = vst [vmem:[%s2323_s28 + $0x38] sm:$0xff] %v1285_v24  ;;  %v1311_v30 = vpop.permute.xlu1 %1310 }
 0x277   : > { %v1333_v39 = vadd.f32 %v2330_v14, %v1311_v30  ;;  %v1334_v31 = vadd.f32 %v2333_v0, %v1311_v30  ;;  %v1363_v36 = vmul.f32 %v2305_v62, %v1339_v29  ;;  %v1364_v20 = vmul.f32 %v2305_v62, %v1340_v43 }
 0x279   : > { %v1341_v38 = vmul.f32 %v1333_v39, %v1181_v6  ;;  %v1342_v48 = vmul.f32 %v1334_v31, %v1182_v45 }
 0x27b   : > { %v1375_v40 = vpop.permute.xlu1 %1374  ;;  %v1365_v51 = vmul.f32 %v2307_v41, %v1341_v38  ;;  %v1366_v59 = vmul.f32 %v2307_v41, %v1342_v48 }
 0x27c   : > { %v1387_v13 = vadd.f32 %v1375_v40, %v1363_v36  ;;  %v1388_v15 = vadd.f32 %v1375_v40, %v1364_v20 }
 0x27e   : > { %1395 = vst [vmem:[%s2347_s10 + $0x10] sm:$0xff] %v1387_v13  ;;  %1396 = vst [vmem:[%s2347_s10 + $0x18] sm:$0xff] %v1388_v15 }
 0x27f   : > { %v1379_v14 = vpop.permute.xlu1 %1378 }
 0x280   : > { %v1389_v18 = vadd.f32 %v1379_v14, %v1365_v51  ;;  %v1390_v5 = vadd.f32 %v1379_v14, %v1366_v59 }
 0x282   : > { %1397 = vst [vmem:[%s2347_s10 + $0x20] sm:$0xff] %v1389_v18  ;;  %1398 = vst [vmem:[%s2347_s10 + $0x28] sm:$0xff] %v1390_v5 }
 0x283 PF: > { %s19_s24 = sadd.s32 1, %s1682_s24  }
 0x284   : > { %p16_p1 = scmp.ge.s32.totalorder %s19_s24, 4  }
 0x286   :  { %18 = sbr.rel (!%p16_p1) target bundleno = 1 (0x1), region = 94 }
 0x28d   :  { %1438 = vsyncpa [#allocation6], 1 }
 0x28e   :  { %1440 = vsyncpa [#allocation6 + $0x1], 1 }

</bundles_post_ra>
